<compile_context>
chip_gen: v7x
topology: tpu7x:2x2x1
jax: 0.10.0
libtpu: 0.0.40
codegen_flags: <defaults>
</compile_context>

<pallas_src>
import functools

import jax
import jax.numpy as jnp
from jax import lax
from jax.experimental import pallas as pl
from jax.experimental.pallas import tpu as pltpu

# Small, deterministic hyperparameters consistent with WavCodec.__init__
STRIDE = 8      # stride_length
HIDDEN = 32     # hidden_size
LAYERS = 2      # num_layers
CODEBOOK = 64   # codebook_size
NQ = 2          # num_quantizers

_LANES = 128    # lane width of the packed parameter slab
_BPAD = 8       # sublane-aligned padded batch


def _slab_offsets():
    """Row offsets of the sections inside the packed parameter slab."""
    H, L, C, N = HIDDEN, LAYERS, CODEBOOK, NQ
    nc = N * C
    o = {}
    o["cb"] = 0                       # (N*C, H)     codebooks, stacked
    o["w_ih"] = nc                    # L x (H, 4H)  input->gates weights
    o["w_hh"] = nc + L * H            # L x (H, 4H)  hidden->gates weights
    o["bias"] = nc + 2 * L * H        # L x (8, 4H)  b_ih+b_hh, pre-broadcast
    o["w_tail"] = o["bias"] + 8 * L   # (H, H+S)     [waveform_proj∘out_proj | out_proj]
    o["b_tail"] = o["w_tail"] + H     # (8, H+S)     fused tail bias, pre-broadcast
    o["init"] = o["b_tail"] + 8       # (8, H)       init_emb, pre-broadcast
    o["rows"] = o["init"] + 8
    return o


def _dequant_kernel(toks_ref, p_ref, hc0_ref, out_ref, hc_out_ref):
    H, L, S, C, N = HIDDEN, LAYERS, STRIDE, CODEBOOK, NQ
    NC = N * C
    _, Bp, _ = hc0_ref.shape          # padded batch (multiple of 8)
    Tq = out_ref.shape[0]
    TB = Tq * Bp
    off = _slab_offsets()

    # ---- RVQ decode: one multi-hot (TB, N*C) @ stacked codebooks (N*C, H) ----
    iota = lax.broadcasted_iota(jnp.int32, (TB, NC), 1)
    hit = iota == toks_ref[0, :, :]
    for n in range(1, N):             # static, small; token ranges disjoint
        hit = jnp.logical_or(hit, iota == (toks_ref[n, :, :] + n * C))
    emb = jnp.dot(hit.astype(jnp.float32), p_ref[0:NC, 0:H],
                  preferred_element_type=jnp.float32)            # (TB, H)

    # ---- static weight slices of the single packed slab (loaded once) ----
    w_ih = [p_ref[off["w_ih"] + l * H:off["w_ih"] + (l + 1) * H, :]
            for l in range(L)]                                   # (H, 4H)
    w_hh = [p_ref[off["w_hh"] + l * H:off["w_hh"] + (l + 1) * H, :]
            for l in range(L)]                                   # (H, 4H)
    w_tail = p_ref[off["w_tail"]:off["w_tail"] + H, 0:H + S]     # (H, H+S)

    def _bias_block(row, width):
        """Pre-broadcast (8, width) bias block; re-broadcast once if Bp != 8."""
        blk = p_ref[row:row + 8, 0:width]
        if Bp == 8:
            return blk
        return jnp.broadcast_to(blk[0:1, :], (Bp, width))

    # biases hoisted OUT of the time loop, already (Bp, .)-shaped
    b_lyr = [_bias_block(off["bias"] + 8 * l, 4 * H) for l in range(L)]
    b_tail = _bias_block(off["b_tail"], H + S)
    init_e = _bias_block(off["init"], H)

    # ---- recurrent state lives in registers across the (unrolled) time loop ----
    h = [hc0_ref[l, :, :] for l in range(L)]
    c = [hc0_ref[L + l, :, :] for l in range(L)]
    wemb = init_e                                                # (Bp, H)

    for t in range(Tq):               # fully unrolled serial recurrence (Tq small)
        x = emb[t * Bp:(t + 1) * Bp, :] + wemb                   # 8-aligned slice
        for l in range(L):            # static layer loop
            gates = (jnp.dot(x, w_ih[l], preferred_element_type=jnp.float32)
                     + jnp.dot(h[l], w_hh[l], preferred_element_type=jnp.float32)
                     + b_lyr[l])                                 # (Bp, 4H)
            sg = jax.nn.sigmoid(gates)    # full-vreg activations, slice after
            tg = jnp.tanh(gates)
            c_new = sg[:, H:2 * H] * c[l] + sg[:, 0:H] * tg[:, 2 * H:3 * H]
            h_new = sg[:, 3 * H:4 * H] * jnp.tanh(c_new)
            c[l] = c_new
            h[l] = h_new
            x = h_new
        # one fused tail matmul: [W_feedback | w_out_t]
        tail = jnp.dot(x, w_tail, preferred_element_type=jnp.float32) + b_tail
        wemb = tail[:, 0:H]               # folded waveform_proj(out_proj(h))
        out_ref[t, :, :] = tail[:, H:H + S]   # per-step store, off the chain

    # ---- final state, one merged output ----
    for l in range(L):
        hc_out_ref[l, :, :] = h[l]
        hc_out_ref[L + l, :, :] = c[l]


def wav_codec_dequantize(toks, packed, state=None):
    """toks: (N, B, Tq) int32. Returns (waveform (B, Tq*STRIDE), (h, c))."""
    N, B, Tq = toks.shape
    H, L, S = HIDDEN, LAYERS, STRIDE
    Bp = max(_BPAD, ((B + 7) // 8) * 8)
    if state is None:
        h0 = jnp.zeros((L, B, H), jnp.float32)
        c0 = jnp.zeros((L, B, H), jnp.float32)
    else:
        h0, c0 = state

    # glue: clamp tokens, time-major, pad batch to Bp, flatten -> (N, Tq*Bp, 1)
    toks_c = jnp.clip(toks.astype(jnp.int32), 0, CODEBOOK - 1)
    toks_t = jnp.transpose(toks_c, (0, 2, 1))                    # (N, Tq, B)
    toks_t = jnp.pad(toks_t, ((0, 0), (0, 0), (0, Bp - B)))
    toks_f = toks_t.reshape(N, Tq * Bp, 1)

    # merged, batch-padded LSTM state input (2L, Bp, H)
    hc0 = jnp.concatenate([h0, c0], axis=0)
    hc0 = jnp.pad(hc0, ((0, 0), (0, Bp - B), (0, 0)))

    vmem = functools.partial(pl.BlockSpec, memory_space=pltpu.MemorySpace.VMEM)
    out_shape = (
        jax.ShapeDtypeStruct((Tq, Bp, S), jnp.float32),          # waveform chunks
        jax.ShapeDtypeStruct((2 * L, Bp, H), jnp.float32),       # final [h; c]
    )
    wav_tbs, hc_out = pl.pallas_call(
        _dequant_kernel,
        out_shape=out_shape,
        in_specs=[vmem(), vmem(), vmem()],
        out_specs=(vmem(), vmem()),
    )(toks_f, packed["slab"], hc0)

    waveform = jnp.transpose(wav_tbs, (1, 0, 2)).reshape(Bp, Tq * S)[:B]
    return waveform, (hc_out[:L, :B], hc_out[L:, :B])


def init_params(key):
    """Deterministic synthetic parameters (shapes from the module __init__)."""
    ks = jax.random.split(key, 9)
    s = 0.1
    H, L, S, C, N = HIDDEN, LAYERS, STRIDE, CODEBOOK, NQ
    return {
        # ResidualVectorQuantization codebooks: (num_quantizers, codebook_size, dim)
        "codebooks": s * jax.random.normal(ks[0], (N, C, H), jnp.float32),
        # nn.LSTM(hidden, hidden, num_layers) weights, pre-transposed for x @ W
        "w_ih_t": s * jax.random.normal(ks[1], (L, H, 4 * H), jnp.float32),
        "w_hh_t": s * jax.random.normal(ks[2], (L, H, 4 * H), jnp.float32),
        "b_ih":   s * jax.random.normal(ks[3], (L, 1, 4 * H), jnp.float32),
        "b_hh":   s * jax.random.normal(ks[4], (L, 1, 4 * H), jnp.float32),
        # out_proj: Linear(hidden, stride)
        "w_out_t": s * jax.random.normal(ks[5], (H, S), jnp.float32),
        "b_out":   s * jax.random.normal(ks[6], (1, S), jnp.float32),
        # waveform_proj: Linear(stride, hidden)
        "w_wp_t": s * jax.random.normal(ks[7], (S, H), jnp.float32),
        "b_wp":   s * jax.random.normal(ks[8], (1, H), jnp.float32),
        # init_emb: nn.Parameter(torch.zeros(1, 1, hidden))
        "init_emb": jnp.zeros((1, H), jnp.float32),
    }


def pack_params(p):
    """Host-side (init-time) folding / fusing / packing into ONE 128-lane slab."""
    H, L, S, C, N = HIDDEN, LAYERS, STRIDE, CODEBOOK, NQ

    def pad_lanes(x):
        return jnp.pad(x, ((0, 0), (0, _LANES - x.shape[1])))

    sections = []
    # stacked codebooks: (N*C, H) padded to 128 lanes
    sections.append(pad_lanes(p["codebooks"].reshape(N * C, H)))
    # per-layer LSTM weights, kept as separate 8-aligned (H, 4H) blocks
    for l in range(L):
        sections.append(p["w_ih_t"][l])
    for l in range(L):
        sections.append(p["w_hh_t"][l])
    # pre-added, pre-broadcast biases (8, 4H), one 8-aligned block per layer
    b_cat = (p["b_ih"] + p["b_hh"]).reshape(L, 4 * H)
    for l in range(L):
        sections.append(jnp.broadcast_to(b_cat[l:l + 1], (_BPAD, 4 * H)))
    # fold waveform_proj into out_proj, fuse feedback + output into one tail
    w_fb = p["w_out_t"] @ p["w_wp_t"]                            # (H, H)
    b_fb = p["b_out"] @ p["w_wp_t"] + p["b_wp"]                  # (1, H)
    w_tail = jnp.concatenate([w_fb, p["w_out_t"]], axis=1)       # (H, H+S)
    b_tail = jnp.concatenate([b_fb, p["b_out"]], axis=1)         # (1, H+S)
    sections.append(pad_lanes(w_tail))
    sections.append(pad_lanes(jnp.broadcast_to(b_tail, (_BPAD, H + S))))
    sections.append(pad_lanes(jnp.broadcast_to(p["init_emb"], (_BPAD, H))))

    slab = jnp.concatenate(sections, axis=0)                     # (320, 128) f32
    assert slab.shape == (_slab_offsets()["rows"], _LANES)
    return {"slab": slab}


def reference_decode(toks, p, state=None):
    """Pure-JAX reference of rvq.decode + decoder.infer (unfolded math)."""
    N, B, Tq = toks.shape
    H, L, S = HIDDEN, LAYERS, STRIDE
    emb = jnp.zeros((B, Tq, H), jnp.float32)
    for n in range(N):
        emb = emb + p["codebooks"][n][toks[n]]
    h = jnp.zeros((L, B, H), jnp.float32) if state is None else state[0]
    c = jnp.zeros((L, B, H), jnp.float32) if state is None else state[1]
    wemb = jnp.broadcast_to(p["init_emb"], (B, H))
    outs = []
    for t in range(Tq):
        x = emb[:, t] + wemb
        new_h, new_c = [], []
        for l in range(L):
            gates = (x @ p["w_ih_t"][l] + h[l] @ p["w_hh_t"][l]
                     + p["b_ih"][l] + p["b_hh"][l])
            i_g = jax.nn.sigmoid(gates[:, 0 * H:1 * H])
            f_g = jax.nn.sigmoid(gates[:, 1 * H:2 * H])
            g_g = jnp.tanh(gates[:, 2 * H:3 * H])
            o_g = jax.nn.sigmoid(gates[:, 3 * H:4 * H])
            c_l = f_g * c[l] + i_g * g_g
            h_l = o_g * jnp.tanh(c_l)
            new_c.append(c_l)
            new_h.append(h_l)
            x = h_l
        h = jnp.stack(new_h)
        c = jnp.stack(new_c)
        out = x @ p["w_out_t"] + p["b_out"]
        outs.append(out)
        wemb = out @ p["w_wp_t"] + p["b_wp"]
    return jnp.concatenate(outs, axis=1), (h, c)


if __name__ == "__main__":
    key = jax.random.PRNGKey(0)
    pkey, tkey = jax.random.split(key)
    raw = init_params(pkey)
    packed = pack_params(raw)

    B, Tq = 2, 8
    toks = jax.random.randint(tkey, (NQ, B, Tq), 0, CODEBOOK, dtype=jnp.int32)

    wav, (h, c) = jax.jit(wav_codec_dequantize)(toks, packed)
    jax.block_until_ready((wav, h, c))

    wav_ref, (h_ref, c_ref) = reference_decode(toks, raw)

    assert wav.shape == (B, Tq * STRIDE)
    assert h.shape == (LAYERS, B, HIDDEN)
    assert c.shape == (LAYERS, B, HIDDEN)
    assert bool(jnp.all(jnp.isfinite(wav)))
    assert bool(jnp.allclose(wav, wav_ref, atol=1e-4, rtol=1e-4))
    assert bool(jnp.allclose(h, h_ref, atol=1e-4, rtol=1e-4))
    assert bool(jnp.allclose(c, c_ref, atol=1e-4, rtol=1e-4))
    print("KERNEL_OK")
</pallas_src>

<mosaic_0001>
module attributes {stable_mosaic.version = 11 : i64} {
  func.func @_dequant_kernel(%arg0: memref<2x64x1xi32, #tpu.memory_space<vmem>>, %arg1: memref<320x128xf32, #tpu.memory_space<vmem>>, %arg2: memref<4x8x32xf32, #tpu.memory_space<vmem>>, %arg3: memref<8x8x8xf32, #tpu.memory_space<vmem>>, %arg4: memref<4x8x32xf32, #tpu.memory_space<vmem>>) attributes {dimension_semantics = [], scalar_prefetch = 0 : i64, scratch_operands = 0 : i64, tpu.core_type = #tpu.core_type<tc>} {
    %0 = tpu.iota {dimensions = array<i32: 1>} : vector<64x128xi32>
    %c0 = arith.constant 0 : index
    %c0_0 = arith.constant 0 : index
    %c0_1 = arith.constant 0 : index
    %1 = vector.load %arg0[%c0, %c0_0, %c0_1] : memref<2x64x1xi32, #tpu.memory_space<vmem>>, vector<1x64x1xi32>
    %2 = vector.shape_cast %1 : vector<1x64x1xi32> to vector<64x1xi32>
    %3 = vector.broadcast %2 : vector<64x1xi32> to vector<64x128xi32>
    %4 = arith.cmpi eq, %0, %3 : vector<64x128xi32>
    %c1 = arith.constant 1 : index
    %c0_2 = arith.constant 0 : index
    %c0_3 = arith.constant 0 : index
    %5 = vector.load %arg0[%c1, %c0_2, %c0_3] : memref<2x64x1xi32, #tpu.memory_space<vmem>>, vector<1x64x1xi32>
    %6 = vector.shape_cast %5 : vector<1x64x1xi32> to vector<64x1xi32>
    %c64_i32 = arith.constant 64 : i32
    %7 = vector.broadcast %c64_i32 : i32 to vector<64x1xi32>
    %8 = arith.addi %6, %7 : vector<64x1xi32>
    %9 = vector.broadcast %8 : vector<64x1xi32> to vector<64x128xi32>
    %10 = arith.cmpi eq, %0, %9 : vector<64x128xi32>
    %11 = arith.ori %4, %10 : vector<64x128xi1>
    %12 = arith.extui %11 : vector<64x128xi1> to vector<64x128xi32>
    %13 = arith.sitofp %12 : vector<64x128xi32> to vector<64x128xf32>
    %c0_4 = arith.constant 0 : index
    %c0_5 = arith.constant 0 : index
    %14 = vector.load %arg1[%c0_4, %c0_5] : memref<320x128xf32, #tpu.memory_space<vmem>>, vector<128x32xf32>
    %cst = arith.constant dense<0.000000e+00> : vector<64x32xf32>
    %15 = tpu.matmul %13, %14, %cst {dimension_numbers = #tpu.dot_dimension_numbers<[1], [0], [0], [1], [0, 0, 1, 1], [], []>} : vector<64x128xf32>, vector<128x32xf32>, vector<64x32xf32> -> vector<64x32xf32>
    %c128 = arith.constant 128 : index
    %c0_6 = arith.constant 0 : index
    %16 = vector.load %arg1[%c128, %c0_6] : memref<320x128xf32, #tpu.memory_space<vmem>>, vector<32x128xf32>
    %c160 = arith.constant 160 : index
    %c0_7 = arith.constant 0 : index
    %17 = vector.load %arg1[%c160, %c0_7] : memref<320x128xf32, #tpu.memory_space<vmem>>, vector<32x128xf32>
    %c192 = arith.constant 192 : index
    %c0_8 = arith.constant 0 : index
    %18 = vector.load %arg1[%c192, %c0_8] : memref<320x128xf32, #tpu.memory_space<vmem>>, vector<32x128xf32>
    %c224 = arith.constant 224 : index
    %c0_9 = arith.constant 0 : index
    %19 = vector.load %arg1[%c224, %c0_9] : memref<320x128xf32, #tpu.memory_space<vmem>>, vector<32x128xf32>
    %c272 = arith.constant 272 : index
    %c0_10 = arith.constant 0 : index
    %20 = vector.load %arg1[%c272, %c0_10] : memref<320x128xf32, #tpu.memory_space<vmem>>, vector<32x40xf32>
    %c256 = arith.constant 256 : index
    %c0_11 = arith.constant 0 : index
    %21 = vector.load %arg1[%c256, %c0_11] : memref<320x128xf32, #tpu.memory_space<vmem>>, vector<8x128xf32>
    %c264 = arith.constant 264 : index
    %c0_12 = arith.constant 0 : index
    %22 = vector.load %arg1[%c264, %c0_12] : memref<320x128xf32, #tpu.memory_space<vmem>>, vector<8x128xf32>
    %c304 = arith.constant 304 : index
    %c0_13 = arith.constant 0 : index
    %23 = vector.load %arg1[%c304, %c0_13] : memref<320x128xf32, #tpu.memory_space<vmem>>, vector<8x40xf32>
    %c312 = arith.constant 312 : index
    %c0_14 = arith.constant 0 : index
    %24 = vector.load %arg1[%c312, %c0_14] : memref<320x128xf32, #tpu.memory_space<vmem>>, vector<8x32xf32>
    %c0_15 = arith.constant 0 : index
    %c0_16 = arith.constant 0 : index
    %c0_17 = arith.constant 0 : index
    %25 = vector.load %arg2[%c0_15, %c0_16, %c0_17] : memref<4x8x32xf32, #tpu.memory_space<vmem>>, vector<1x8x32xf32>
    %26 = vector.shape_cast %25 : vector<1x8x32xf32> to vector<8x32xf32>
    %c1_18 = arith.constant 1 : index
    %c0_19 = arith.constant 0 : index
    %c0_20 = arith.constant 0 : index
    %27 = vector.load %arg2[%c1_18, %c0_19, %c0_20] : memref<4x8x32xf32, #tpu.memory_space<vmem>>, vector<1x8x32xf32>
    %28 = vector.shape_cast %27 : vector<1x8x32xf32> to vector<8x32xf32>
    %c2 = arith.constant 2 : index
    %c0_21 = arith.constant 0 : index
    %c0_22 = arith.constant 0 : index
    %29 = vector.load %arg2[%c2, %c0_21, %c0_22] : memref<4x8x32xf32, #tpu.memory_space<vmem>>, vector<1x8x32xf32>
    %30 = vector.shape_cast %29 : vector<1x8x32xf32> to vector<8x32xf32>
    %c3 = arith.constant 3 : index
    %c0_23 = arith.constant 0 : index
    %c0_24 = arith.constant 0 : index
    %31 = vector.load %arg2[%c3, %c0_23, %c0_24] : memref<4x8x32xf32, #tpu.memory_space<vmem>>, vector<1x8x32xf32>
    %32 = vector.shape_cast %31 : vector<1x8x32xf32> to vector<8x32xf32>
    %33 = vector.extract_strided_slice %15 {offsets = [0, 0], sizes = [8, 32], strides = [1, 1]} : vector<64x32xf32> to vector<8x32xf32>
    %34 = arith.addf %33, %24 : vector<8x32xf32>
    %cst_25 = arith.constant dense<0.000000e+00> : vector<8x128xf32>
    %35 = tpu.matmul %34, %16, %cst_25 {dimension_numbers = #tpu.dot_dimension_numbers<[1], [0], [0], [1], [0, 0, 1, 1], [], []>} : vector<8x32xf32>, vector<32x128xf32>, vector<8x128xf32> -> vector<8x128xf32>
    %cst_26 = arith.constant dense<0.000000e+00> : vector<8x128xf32>
    %36 = tpu.matmul %26, %18, %cst_26 {dimension_numbers = #tpu.dot_dimension_numbers<[1], [0], [0], [1], [0, 0, 1, 1], [], []>} : vector<8x32xf32>, vector<32x128xf32>, vector<8x128xf32> -> vector<8x128xf32>
    %37 = arith.addf %35, %36 : vector<8x128xf32>
    %38 = arith.addf %37, %21 : vector<8x128xf32>
    %39 = arith.negf %38 : vector<8x128xf32>
    %40 = math.exp %39 : vector<8x128xf32>
    %cst_27 = arith.constant 1.000000e+00 : f32
    %41 = vector.broadcast %cst_27 : f32 to vector<8x128xf32>
    %42 = arith.addf %41, %40 : vector<8x128xf32>
    %43 = arith.divf %41, %42 : vector<8x128xf32>
    %44 = math.tanh %38 : vector<8x128xf32>
    %45 = vector.extract_strided_slice %43 {offsets = [0, 32], sizes = [8, 32], strides = [1, 1]} : vector<8x128xf32> to vector<8x32xf32>
    %46 = arith.mulf %45, %30 : vector<8x32xf32>
    %47 = vector.extract_strided_slice %43 {offsets = [0, 0], sizes = [8, 32], strides = [1, 1]} : vector<8x128xf32> to vector<8x32xf32>
    %48 = vector.extract_strided_slice %44 {offsets = [0, 64], sizes = [8, 32], strides = [1, 1]} : vector<8x128xf32> to vector<8x32xf32>
    %49 = arith.mulf %47, %48 : vector<8x32xf32>
    %50 = arith.addf %46, %49 : vector<8x32xf32>
    %51 = vector.extract_strided_slice %43 {offsets = [0, 96], sizes = [8, 32], strides = [1, 1]} : vector<8x128xf32> to vector<8x32xf32>
    %52 = math.tanh %50 : vector<8x32xf32>
    %53 = arith.mulf %51, %52 : vector<8x32xf32>
    %cst_28 = arith.constant dense<0.000000e+00> : vector<8x128xf32>
    %54 = tpu.matmul %53, %17, %cst_28 {dimension_numbers = #tpu.dot_dimension_numbers<[1], [0], [0], [1], [0, 0, 1, 1], [], []>} : vector<8x32xf32>, vector<32x128xf32>, vector<8x128xf32> -> vector<8x128xf32>
    %cst_29 = arith.constant dense<0.000000e+00> : vector<8x128xf32>
    %55 = tpu.matmul %28, %19, %cst_29 {dimension_numbers = #tpu.dot_dimension_numbers<[1], [0], [0], [1], [0, 0, 1, 1], [], []>} : vector<8x32xf32>, vector<32x128xf32>, vector<8x128xf32> -> vector<8x128xf32>
    %56 = arith.addf %54, %55 : vector<8x128xf32>
    %57 = arith.addf %56, %22 : vector<8x128xf32>
    %58 = arith.negf %57 : vector<8x128xf32>
    %59 = math.exp %58 : vector<8x128xf32>
    %cst_30 = arith.constant 1.000000e+00 : f32
    %60 = vector.broadcast %cst_30 : f32 to vector<8x128xf32>
    %61 = arith.addf %60, %59 : vector<8x128xf32>
    %62 = arith.divf %60, %61 : vector<8x128xf32>
    %63 = math.tanh %57 : vector<8x128xf32>
    %64 = vector.extract_strided_slice %62 {offsets = [0, 32], sizes = [8, 32], strides = [1, 1]} : vector<8x128xf32> to vector<8x32xf32>
    %65 = arith.mulf %64, %32 : vector<8x32xf32>
    %66 = vector.extract_strided_slice %62 {offsets = [0, 0], sizes = [8, 32], strides = [1, 1]} : vector<8x128xf32> to vector<8x32xf32>
    %67 = vector.extract_strided_slice %63 {offsets = [0, 64], sizes = [8, 32], strides = [1, 1]} : vector<8x128xf32> to vector<8x32xf32>
    %68 = arith.mulf %66, %67 : vector<8x32xf32>
    %69 = arith.addf %65, %68 : vector<8x32xf32>
    %70 = vector.extract_strided_slice %62 {offsets = [0, 96], sizes = [8, 32], strides = [1, 1]} : vector<8x128xf32> to vector<8x32xf32>
    %71 = math.tanh %69 : vector<8x32xf32>
    %72 = arith.mulf %70, %71 : vector<8x32xf32>
    %cst_31 = arith.constant dense<0.000000e+00> : vector<8x40xf32>
    %73 = tpu.matmul %72, %20, %cst_31 {dimension_numbers = #tpu.dot_dimension_numbers<[1], [0], [0], [1], [0, 0, 1, 1], [], []>} : vector<8x32xf32>, vector<32x40xf32>, vector<8x40xf32> -> vector<8x40xf32>
    %74 = arith.addf %73, %23 : vector<8x40xf32>
    %75 = vector.extract_strided_slice %74 {offsets = [0, 0], sizes = [8, 32], strides = [1, 1]} : vector<8x40xf32> to vector<8x32xf32>
    %76 = vector.extract_strided_slice %74 {offsets = [0, 32], sizes = [8, 8], strides = [1, 1]} : vector<8x40xf32> to vector<8x8xf32>
    %c0_32 = arith.constant 0 : index
    %c0_33 = arith.constant 0 : index
    %c0_34 = arith.constant 0 : index
    %77 = vector.load %arg3[%c0_32, %c0_33, %c0_34] : memref<8x8x8xf32, #tpu.memory_space<vmem>>, vector<1x8x8xf32>
    %78 = vector.shape_cast %77 : vector<1x8x8xf32> to vector<8x8xf32>
    %79 = vector.shape_cast %76 : vector<8x8xf32> to vector<1x8x8xf32>
    tpu.vector_store %arg3[%c0_32, %c0_33, %c0_34], %79 {strides = array<i32>} : memref<8x8x8xf32, #tpu.memory_space<vmem>>, vector<1x8x8xf32>,
    %80 = vector.extract_strided_slice %15 {offsets = [8, 0], sizes = [8, 32], strides = [1, 1]} : vector<64x32xf32> to vector<8x32xf32>
    %81 = arith.addf %80, %75 : vector<8x32xf32>
    %cst_35 = arith.constant dense<0.000000e+00> : vector<8x128xf32>
    %82 = tpu.matmul %81, %16, %cst_35 {dimension_numbers = #tpu.dot_dimension_numbers<[1], [0], [0], [1], [0, 0, 1, 1], [], []>} : vector<8x32xf32>, vector<32x128xf32>, vector<8x128xf32> -> vector<8x128xf32>
    %cst_36 = arith.constant dense<0.000000e+00> : vector<8x128xf32>
    %83 = tpu.matmul %53, %18, %cst_36 {dimension_numbers = #tpu.dot_dimension_numbers<[1], [0], [0], [1], [0, 0, 1, 1], [], []>} : vector<8x32xf32>, vector<32x128xf32>, vector<8x128xf32> -> vector<8x128xf32>
    %84 = arith.addf %82, %83 : vector<8x128xf32>
    %85 = arith.addf %84, %21 : vector<8x128xf32>
    %86 = arith.negf %85 : vector<8x128xf32>
    %87 = math.exp %86 : vector<8x128xf32>
    %cst_37 = arith.constant 1.000000e+00 : f32
    %88 = vector.broadcast %cst_37 : f32 to vector<8x128xf32>
    %89 = arith.addf %88, %87 : vector<8x128xf32>
    %90 = arith.divf %88, %89 : vector<8x128xf32>
    %91 = math.tanh %85 : vector<8x128xf32>
    %92 = vector.extract_strided_slice %90 {offsets = [0, 32], sizes = [8, 32], strides = [1, 1]} : vector<8x128xf32> to vector<8x32xf32>
    %93 = arith.mulf %92, %50 : vector<8x32xf32>
    %94 = vector.extract_strided_slice %90 {offsets = [0, 0], sizes = [8, 32], strides = [1, 1]} : vector<8x128xf32> to vector<8x32xf32>
    %95 = vector.extract_strided_slice %91 {offsets = [0, 64], sizes = [8, 32], strides = [1, 1]} : vector<8x128xf32> to vector<8x32xf32>
    %96 = arith.mulf %94, %95 : vector<8x32xf32>
    %97 = arith.addf %93, %96 : vector<8x32xf32>
    %98 = vector.extract_strided_slice %90 {offsets = [0, 96], sizes = [8, 32], strides = [1, 1]} : vector<8x128xf32> to vector<8x32xf32>
    %99 = math.tanh %97 : vector<8x32xf32>
    %100 = arith.mulf %98, %99 : vector<8x32xf32>
    %cst_38 = arith.constant dense<0.000000e+00> : vector<8x128xf32>
    %101 = tpu.matmul %100, %17, %cst_38 {dimension_numbers = #tpu.dot_dimension_numbers<[1], [0], [0], [1], [0, 0, 1, 1], [], []>} : vector<8x32xf32>, vector<32x128xf32>, vector<8x128xf32> -> vector<8x128xf32>
    %cst_39 = arith.constant dense<0.000000e+00> : vector<8x128xf32>
    %102 = tpu.matmul %72, %19, %cst_39 {dimension_numbers = #tpu.dot_dimension_numbers<[1], [0], [0], [1], [0, 0, 1, 1], [], []>} : vector<8x32xf32>, vector<32x128xf32>, vector<8x128xf32> -> vector<8x128xf32>
    %103 = arith.addf %101, %102 : vector<8x128xf32>
    %104 = arith.addf %103, %22 : vector<8x128xf32>
    %105 = arith.negf %104 : vector<8x128xf32>
    %106 = math.exp %105 : vector<8x128xf32>
    %cst_40 = arith.constant 1.000000e+00 : f32
    %107 = vector.broadcast %cst_40 : f32 to vector<8x128xf32>
    %108 = arith.addf %107, %106 : vector<8x128xf32>
    %109 = arith.divf %107, %108 : vector<8x128xf32>
    %110 = math.tanh %104 : vector<8x128xf32>
    %111 = vector.extract_strided_slice %109 {offsets = [0, 32], sizes = [8, 32], strides = [1, 1]} : vector<8x128xf32> to vector<8x32xf32>
    %112 = arith.mulf %111, %69 : vector<8x32xf32>
    %113 = vector.extract_strided_slice %109 {offsets = [0, 0], sizes = [8, 32], strides = [1, 1]} : vector<8x128xf32> to vector<8x32xf32>
    %114 = vector.extract_strided_slice %110 {offsets = [0, 64], sizes = [8, 32], strides = [1, 1]} : vector<8x128xf32> to vector<8x32xf32>
    %115 = arith.mulf %113, %114 : vector<8x32xf32>
    %116 = arith.addf %112, %115 : vector<8x32xf32>
    %117 = vector.extract_strided_slice %109 {offsets = [0, 96], sizes = [8, 32], strides = [1, 1]} : vector<8x128xf32> to vector<8x32xf32>
    %118 = math.tanh %116 : vector<8x32xf32>
    %119 = arith.mulf %117, %118 : vector<8x32xf32>
    %cst_41 = arith.constant dense<0.000000e+00> : vector<8x40xf32>
    %120 = tpu.matmul %119, %20, %cst_41 {dimension_numbers = #tpu.dot_dimension_numbers<[1], [0], [0], [1], [0, 0, 1, 1], [], []>} : vector<8x32xf32>, vector<32x40xf32>, vector<8x40xf32> -> vector<8x40xf32>
    %121 = arith.addf %120, %23 : vector<8x40xf32>
    %122 = vector.extract_strided_slice %121 {offsets = [0, 0], sizes = [8, 32], strides = [1, 1]} : vector<8x40xf32> to vector<8x32xf32>
    %123 = vector.extract_strided_slice %121 {offsets = [0, 32], sizes = [8, 8], strides = [1, 1]} : vector<8x40xf32> to vector<8x8xf32>
    %c1_42 = arith.constant 1 : index
    %c0_43 = arith.constant 0 : index
    %c0_44 = arith.constant 0 : index
    %124 = vector.load %arg3[%c1_42, %c0_43, %c0_44] : memref<8x8x8xf32, #tpu.memory_space<vmem>>, vector<1x8x8xf32>
    %125 = vector.shape_cast %124 : vector<1x8x8xf32> to vector<8x8xf32>
    %126 = vector.shape_cast %123 : vector<8x8xf32> to vector<1x8x8xf32>
    tpu.vector_store %arg3[%c1_42, %c0_43, %c0_44], %126 {strides = array<i32>} : memref<8x8x8xf32, #tpu.memory_space<vmem>>, vector<1x8x8xf32>,
    %127 = vector.extract_strided_slice %15 {offsets = [16, 0], sizes = [8, 32], strides = [1, 1]} : vector<64x32xf32> to vector<8x32xf32>
    %128 = arith.addf %127, %122 : vector<8x32xf32>
    %cst_45 = arith.constant dense<0.000000e+00> : vector<8x128xf32>
    %129 = tpu.matmul %128, %16, %cst_45 {dimension_numbers = #tpu.dot_dimension_numbers<[1], [0], [0], [1], [0, 0, 1, 1], [], []>} : vector<8x32xf32>, vector<32x128xf32>, vector<8x128xf32> -> vector<8x128xf32>
    %cst_46 = arith.constant dense<0.000000e+00> : vector<8x128xf32>
    %130 = tpu.matmul %100, %18, %cst_46 {dimension_numbers = #tpu.dot_dimension_numbers<[1], [0], [0], [1], [0, 0, 1, 1], [], []>} : vector<8x32xf32>, vector<32x128xf32>, vector<8x128xf32> -> vector<8x128xf32>
    %131 = arith.addf %129, %130 : vector<8x128xf32>
    %132 = arith.addf %131, %21 : vector<8x128xf32>
    %133 = arith.negf %132 : vector<8x128xf32>
    %134 = math.exp %133 : vector<8x128xf32>
    %cst_47 = arith.constant 1.000000e+00 : f32
    %135 = vector.broadcast %cst_47 : f32 to vector<8x128xf32>
    %136 = arith.addf %135, %134 : vector<8x128xf32>
    %137 = arith.divf %135, %136 : vector<8x128xf32>
    %138 = math.tanh %132 : vector<8x128xf32>
    %139 = vector.extract_strided_slice %137 {offsets = [0, 32], sizes = [8, 32], strides = [1, 1]} : vector<8x128xf32> to vector<8x32xf32>
    %140 = arith.mulf %139, %97 : vector<8x32xf32>
    %141 = vector.extract_strided_slice %137 {offsets = [0, 0], sizes = [8, 32], strides = [1, 1]} : vector<8x128xf32> to vector<8x32xf32>
    %142 = vector.extract_strided_slice %138 {offsets = [0, 64], sizes = [8, 32], strides = [1, 1]} : vector<8x128xf32> to vector<8x32xf32>
    %143 = arith.mulf %141, %142 : vector<8x32xf32>
    %144 = arith.addf %140, %143 : vector<8x32xf32>
    %145 = vector.extract_strided_slice %137 {offsets = [0, 96], sizes = [8, 32], strides = [1, 1]} : vector<8x128xf32> to vector<8x32xf32>
    %146 = math.tanh %144 : vector<8x32xf32>
    %147 = arith.mulf %145, %146 : vector<8x32xf32>
    %cst_48 = arith.constant dense<0.000000e+00> : vector<8x128xf32>
    %148 = tpu.matmul %147, %17, %cst_48 {dimension_numbers = #tpu.dot_dimension_numbers<[1], [0], [0], [1], [0, 0, 1, 1], [], []>} : vector<8x32xf32>, vector<32x128xf32>, vector<8x128xf32> -> vector<8x128xf32>
    %cst_49 = arith.constant dense<0.000000e+00> : vector<8x128xf32>
    %149 = tpu.matmul %119, %19, %cst_49 {dimension_numbers = #tpu.dot_dimension_numbers<[1], [0], [0], [1], [0, 0, 1, 1], [], []>} : vector<8x32xf32>, vector<32x128xf32>, vector<8x128xf32> -> vector<8x128xf32>
    %150 = arith.addf %148, %149 : vector<8x128xf32>
    %151 = arith.addf %150, %22 : vector<8x128xf32>
    %152 = arith.negf %151 : vector<8x128xf32>
    %153 = math.exp %152 : vector<8x128xf32>
    %cst_50 = arith.constant 1.000000e+00 : f32
    %154 = vector.broadcast %cst_50 : f32 to vector<8x128xf32>
    %155 = arith.addf %154, %153 : vector<8x128xf32>
    %156 = arith.divf %154, %155 : vector<8x128xf32>
    %157 = math.tanh %151 : vector<8x128xf32>
    %158 = vector.extract_strided_slice %156 {offsets = [0, 32], sizes = [8, 32], strides = [1, 1]} : vector<8x128xf32> to vector<8x32xf32>
    %159 = arith.mulf %158, %116 : vector<8x32xf32>
    %160 = vector.extract_strided_slice %156 {offsets = [0, 0], sizes = [8, 32], strides = [1, 1]} : vector<8x128xf32> to vector<8x32xf32>
    %161 = vector.extract_strided_slice %157 {offsets = [0, 64], sizes = [8, 32], strides = [1, 1]} : vector<8x128xf32> to vector<8x32xf32>
    %162 = arith.mulf %160, %161 : vector<8x32xf32>
    %163 = arith.addf %159, %162 : vector<8x32xf32>
    %164 = vector.extract_strided_slice %156 {offsets = [0, 96], sizes = [8, 32], strides = [1, 1]} : vector<8x128xf32> to vector<8x32xf32>
    %165 = math.tanh %163 : vector<8x32xf32>
    %166 = arith.mulf %164, %165 : vector<8x32xf32>
    %cst_51 = arith.constant dense<0.000000e+00> : vector<8x40xf32>
    %167 = tpu.matmul %166, %20, %cst_51 {dimension_numbers = #tpu.dot_dimension_numbers<[1], [0], [0], [1], [0, 0, 1, 1], [], []>} : vector<8x32xf32>, vector<32x40xf32>, vector<8x40xf32> -> vector<8x40xf32>
    %168 = arith.addf %167, %23 : vector<8x40xf32>
    %169 = vector.extract_strided_slice %168 {offsets = [0, 0], sizes = [8, 32], strides = [1, 1]} : vector<8x40xf32> to vector<8x32xf32>
    %170 = vector.extract_strided_slice %168 {offsets = [0, 32], sizes = [8, 8], strides = [1, 1]} : vector<8x40xf32> to vector<8x8xf32>
    %c2_52 = arith.constant 2 : index
    %c0_53 = arith.constant 0 : index
    %c0_54 = arith.constant 0 : index
    %171 = vector.load %arg3[%c2_52, %c0_53, %c0_54] : memref<8x8x8xf32, #tpu.memory_space<vmem>>, vector<1x8x8xf32>
    %172 = vector.shape_cast %171 : vector<1x8x8xf32> to vector<8x8xf32>
    %173 = vector.shape_cast %170 : vector<8x8xf32> to vector<1x8x8xf32>
    tpu.vector_store %arg3[%c2_52, %c0_53, %c0_54], %173 {strides = array<i32>} : memref<8x8x8xf32, #tpu.memory_space<vmem>>, vector<1x8x8xf32>,
    %174 = vector.extract_strided_slice %15 {offsets = [24, 0], sizes = [8, 32], strides = [1, 1]} : vector<64x32xf32> to vector<8x32xf32>
    %175 = arith.addf %174, %169 : vector<8x32xf32>
    %cst_55 = arith.constant dense<0.000000e+00> : vector<8x128xf32>
    %176 = tpu.matmul %175, %16, %cst_55 {dimension_numbers = #tpu.dot_dimension_numbers<[1], [0], [0], [1], [0, 0, 1, 1], [], []>} : vector<8x32xf32>, vector<32x128xf32>, vector<8x128xf32> -> vector<8x128xf32>
    %cst_56 = arith.constant dense<0.000000e+00> : vector<8x128xf32>
    %177 = tpu.matmul %147, %18, %cst_56 {dimension_numbers = #tpu.dot_dimension_numbers<[1], [0], [0], [1], [0, 0, 1, 1], [], []>} : vector<8x32xf32>, vector<32x128xf32>, vector<8x128xf32> -> vector<8x128xf32>
    %178 = arith.addf %176, %177 : vector<8x128xf32>
    %179 = arith.addf %178, %21 : vector<8x128xf32>
    %180 = arith.negf %179 : vector<8x128xf32>
    %181 = math.exp %180 : vector<8x128xf32>
    %cst_57 = arith.constant 1.000000e+00 : f32
    %182 = vector.broadcast %cst_57 : f32 to vector<8x128xf32>
    %183 = arith.addf %182, %181 : vector<8x128xf32>
    %184 = arith.divf %182, %183 : vector<8x128xf32>
    %185 = math.tanh %179 : vector<8x128xf32>
    %186 = vector.extract_strided_slice %184 {offsets = [0, 32], sizes = [8, 32], strides = [1, 1]} : vector<8x128xf32> to vector<8x32xf32>
    %187 = arith.mulf %186, %144 : vector<8x32xf32>
    %188 = vector.extract_strided_slice %184 {offsets = [0, 0], sizes = [8, 32], strides = [1, 1]} : vector<8x128xf32> to vector<8x32xf32>
    %189 = vector.extract_strided_slice %185 {offsets = [0, 64], sizes = [8, 32], strides = [1, 1]} : vector<8x128xf32> to vector<8x32xf32>
    %190 = arith.mulf %188, %189 : vector<8x32xf32>
    %191 = arith.addf %187, %190 : vector<8x32xf32>
    %192 = vector.extract_strided_slice %184 {offsets = [0, 96], sizes = [8, 32], strides = [1, 1]} : vector<8x128xf32> to vector<8x32xf32>
    %193 = math.tanh %191 : vector<8x32xf32>
    %194 = arith.mulf %192, %193 : vector<8x32xf32>
    %cst_58 = arith.constant dense<0.000000e+00> : vector<8x128xf32>
    %195 = tpu.matmul %194, %17, %cst_58 {dimension_numbers = #tpu.dot_dimension_numbers<[1], [0], [0], [1], [0, 0, 1, 1], [], []>} : vector<8x32xf32>, vector<32x128xf32>, vector<8x128xf32> -> vector<8x128xf32>
    %cst_59 = arith.constant dense<0.000000e+00> : vector<8x128xf32>
    %196 = tpu.matmul %166, %19, %cst_59 {dimension_numbers = #tpu.dot_dimension_numbers<[1], [0], [0], [1], [0, 0, 1, 1], [], []>} : vector<8x32xf32>, vector<32x128xf32>, vector<8x128xf32> -> vector<8x128xf32>
    %197 = arith.addf %195, %196 : vector<8x128xf32>
    %198 = arith.addf %197, %22 : vector<8x128xf32>
    %199 = arith.negf %198 : vector<8x128xf32>
    %200 = math.exp %199 : vector<8x128xf32>
    %cst_60 = arith.constant 1.000000e+00 : f32
    %201 = vector.broadcast %cst_60 : f32 to vector<8x128xf32>
    %202 = arith.addf %201, %200 : vector<8x128xf32>
    %203 = arith.divf %201, %202 : vector<8x128xf32>
    %204 = math.tanh %198 : vector<8x128xf32>
    %205 = vector.extract_strided_slice %203 {offsets = [0, 32], sizes = [8, 32], strides = [1, 1]} : vector<8x128xf32> to vector<8x32xf32>
    %206 = arith.mulf %205, %163 : vector<8x32xf32>
    %207 = vector.extract_strided_slice %203 {offsets = [0, 0], sizes = [8, 32], strides = [1, 1]} : vector<8x128xf32> to vector<8x32xf32>
    %208 = vector.extract_strided_slice %204 {offsets = [0, 64], sizes = [8, 32], strides = [1, 1]} : vector<8x128xf32> to vector<8x32xf32>
    %209 = arith.mulf %207, %208 : vector<8x32xf32>
    %210 = arith.addf %206, %209 : vector<8x32xf32>
    %211 = vector.extract_strided_slice %203 {offsets = [0, 96], sizes = [8, 32], strides = [1, 1]} : vector<8x128xf32> to vector<8x32xf32>
    %212 = math.tanh %210 : vector<8x32xf32>
    %213 = arith.mulf %211, %212 : vector<8x32xf32>
    %cst_61 = arith.constant dense<0.000000e+00> : vector<8x40xf32>
    %214 = tpu.matmul %213, %20, %cst_61 {dimension_numbers = #tpu.dot_dimension_numbers<[1], [0], [0], [1], [0, 0, 1, 1], [], []>} : vector<8x32xf32>, vector<32x40xf32>, vector<8x40xf32> -> vector<8x40xf32>
    %215 = arith.addf %214, %23 : vector<8x40xf32>
    %216 = vector.extract_strided_slice %215 {offsets = [0, 0], sizes = [8, 32], strides = [1, 1]} : vector<8x40xf32> to vector<8x32xf32>
    %217 = vector.extract_strided_slice %215 {offsets = [0, 32], sizes = [8, 8], strides = [1, 1]} : vector<8x40xf32> to vector<8x8xf32>
    %c3_62 = arith.constant 3 : index
    %c0_63 = arith.constant 0 : index
    %c0_64 = arith.constant 0 : index
    %218 = vector.load %arg3[%c3_62, %c0_63, %c0_64] : memref<8x8x8xf32, #tpu.memory_space<vmem>>, vector<1x8x8xf32>
    %219 = vector.shape_cast %218 : vector<1x8x8xf32> to vector<8x8xf32>
    %220 = vector.shape_cast %217 : vector<8x8xf32> to vector<1x8x8xf32>
    tpu.vector_store %arg3[%c3_62, %c0_63, %c0_64], %220 {strides = array<i32>} : memref<8x8x8xf32, #tpu.memory_space<vmem>>, vector<1x8x8xf32>,
    %221 = vector.extract_strided_slice %15 {offsets = [32, 0], sizes = [8, 32], strides = [1, 1]} : vector<64x32xf32> to vector<8x32xf32>
    %222 = arith.addf %221, %216 : vector<8x32xf32>
    %cst_65 = arith.constant dense<0.000000e+00> : vector<8x128xf32>
    %223 = tpu.matmul %222, %16, %cst_65 {dimension_numbers = #tpu.dot_dimension_numbers<[1], [0], [0], [1], [0, 0, 1, 1], [], []>} : vector<8x32xf32>, vector<32x128xf32>, vector<8x128xf32> -> vector<8x128xf32>
    %cst_66 = arith.constant dense<0.000000e+00> : vector<8x128xf32>
    %224 = tpu.matmul %194, %18, %cst_66 {dimension_numbers = #tpu.dot_dimension_numbers<[1], [0], [0], [1], [0, 0, 1, 1], [], []>} : vector<8x32xf32>, vector<32x128xf32>, vector<8x128xf32> -> vector<8x128xf32>
    %225 = arith.addf %223, %224 : vector<8x128xf32>
    %226 = arith.addf %225, %21 : vector<8x128xf32>
    %227 = arith.negf %226 : vector<8x128xf32>
    %228 = math.exp %227 : vector<8x128xf32>
    %cst_67 = arith.constant 1.000000e+00 : f32
    %229 = vector.broadcast %cst_67 : f32 to vector<8x128xf32>
    %230 = arith.addf %229, %228 : vector<8x128xf32>
    %231 = arith.divf %229, %230 : vector<8x128xf32>
    %232 = math.tanh %226 : vector<8x128xf32>
    %233 = vector.extract_strided_slice %231 {offsets = [0, 32], sizes = [8, 32], strides = [1, 1]} : vector<8x128xf32> to vector<8x32xf32>
    %234 = arith.mulf %233, %191 : vector<8x32xf32>
    %235 = vector.extract_strided_slice %231 {offsets = [0, 0], sizes = [8, 32], strides = [1, 1]} : vector<8x128xf32> to vector<8x32xf32>
    %236 = vector.extract_strided_slice %232 {offsets = [0, 64], sizes = [8, 32], strides = [1, 1]} : vector<8x128xf32> to vector<8x32xf32>
    %237 = arith.mulf %235, %236 : vector<8x32xf32>
    %238 = arith.addf %234, %237 : vector<8x32xf32>
    %239 = vector.extract_strided_slice %231 {offsets = [0, 96], sizes = [8, 32], strides = [1, 1]} : vector<8x128xf32> to vector<8x32xf32>
    %240 = math.tanh %238 : vector<8x32xf32>
    %241 = arith.mulf %239, %240 : vector<8x32xf32>
    %cst_68 = arith.constant dense<0.000000e+00> : vector<8x128xf32>
    %242 = tpu.matmul %241, %17, %cst_68 {dimension_numbers = #tpu.dot_dimension_numbers<[1], [0], [0], [1], [0, 0, 1, 1], [], []>} : vector<8x32xf32>, vector<32x128xf32>, vector<8x128xf32> -> vector<8x128xf32>
    %cst_69 = arith.constant dense<0.000000e+00> : vector<8x128xf32>
    %243 = tpu.matmul %213, %19, %cst_69 {dimension_numbers = #tpu.dot_dimension_numbers<[1], [0], [0], [1], [0, 0, 1, 1], [], []>} : vector<8x32xf32>, vector<32x128xf32>, vector<8x128xf32> -> vector<8x128xf32>
    %244 = arith.addf %242, %243 : vector<8x128xf32>
    %245 = arith.addf %244, %22 : vector<8x128xf32>
    %246 = arith.negf %245 : vector<8x128xf32>
    %247 = math.exp %246 : vector<8x128xf32>
    %cst_70 = arith.constant 1.000000e+00 : f32
    %248 = vector.broadcast %cst_70 : f32 to vector<8x128xf32>
    %249 = arith.addf %248, %247 : vector<8x128xf32>
    %250 = arith.divf %248, %249 : vector<8x128xf32>
    %251 = math.tanh %245 : vector<8x128xf32>
    %252 = vector.extract_strided_slice %250 {offsets = [0, 32], sizes = [8, 32], strides = [1, 1]} : vector<8x128xf32> to vector<8x32xf32>
    %253 = arith.mulf %252, %210 : vector<8x32xf32>
    %254 = vector.extract_strided_slice %250 {offsets = [0, 0], sizes = [8, 32], strides = [1, 1]} : vector<8x128xf32> to vector<8x32xf32>
    %255 = vector.extract_strided_slice %251 {offsets = [0, 64], sizes = [8, 32], strides = [1, 1]} : vector<8x128xf32> to vector<8x32xf32>
    %256 = arith.mulf %254, %255 : vector<8x32xf32>
    %257 = arith.addf %253, %256 : vector<8x32xf32>
    %258 = vector.extract_strided_slice %250 {offsets = [0, 96], sizes = [8, 32], strides = [1, 1]} : vector<8x128xf32> to vector<8x32xf32>
    %259 = math.tanh %257 : vector<8x32xf32>
    %260 = arith.mulf %258, %259 : vector<8x32xf32>
    %cst_71 = arith.constant dense<0.000000e+00> : vector<8x40xf32>
    %261 = tpu.matmul %260, %20, %cst_71 {dimension_numbers = #tpu.dot_dimension_numbers<[1], [0], [0], [1], [0, 0, 1, 1], [], []>} : vector<8x32xf32>, vector<32x40xf32>, vector<8x40xf32> -> vector<8x40xf32>
    %262 = arith.addf %261, %23 : vector<8x40xf32>
    %263 = vector.extract_strided_slice %262 {offsets = [0, 0], sizes = [8, 32], strides = [1, 1]} : vector<8x40xf32> to vector<8x32xf32>
    %264 = vector.extract_strided_slice %262 {offsets = [0, 32], sizes = [8, 8], strides = [1, 1]} : vector<8x40xf32> to vector<8x8xf32>
    %c4 = arith.constant 4 : index
    %c0_72 = arith.constant 0 : index
    %c0_73 = arith.constant 0 : index
    %265 = vector.load %arg3[%c4, %c0_72, %c0_73] : memref<8x8x8xf32, #tpu.memory_space<vmem>>, vector<1x8x8xf32>
    %266 = vector.shape_cast %265 : vector<1x8x8xf32> to vector<8x8xf32>
    %267 = vector.shape_cast %264 : vector<8x8xf32> to vector<1x8x8xf32>
    tpu.vector_store %arg3[%c4, %c0_72, %c0_73], %267 {strides = array<i32>} : memref<8x8x8xf32, #tpu.memory_space<vmem>>, vector<1x8x8xf32>,
    %268 = vector.extract_strided_slice %15 {offsets = [40, 0], sizes = [8, 32], strides = [1, 1]} : vector<64x32xf32> to vector<8x32xf32>
    %269 = arith.addf %268, %263 : vector<8x32xf32>
    %cst_74 = arith.constant dense<0.000000e+00> : vector<8x128xf32>
    %270 = tpu.matmul %269, %16, %cst_74 {dimension_numbers = #tpu.dot_dimension_numbers<[1], [0], [0], [1], [0, 0, 1, 1], [], []>} : vector<8x32xf32>, vector<32x128xf32>, vector<8x128xf32> -> vector<8x128xf32>
    %cst_75 = arith.constant dense<0.000000e+00> : vector<8x128xf32>
    %271 = tpu.matmul %241, %18, %cst_75 {dimension_numbers = #tpu.dot_dimension_numbers<[1], [0], [0], [1], [0, 0, 1, 1], [], []>} : vector<8x32xf32>, vector<32x128xf32>, vector<8x128xf32> -> vector<8x128xf32>
    %272 = arith.addf %270, %271 : vector<8x128xf32>
    %273 = arith.addf %272, %21 : vector<8x128xf32>
    %274 = arith.negf %273 : vector<8x128xf32>
    %275 = math.exp %274 : vector<8x128xf32>
    %cst_76 = arith.constant 1.000000e+00 : f32
    %276 = vector.broadcast %cst_76 : f32 to vector<8x128xf32>
    %277 = arith.addf %276, %275 : vector<8x128xf32>
    %278 = arith.divf %276, %277 : vector<8x128xf32>
    %279 = math.tanh %273 : vector<8x128xf32>
    %280 = vector.extract_strided_slice %278 {offsets = [0, 32], sizes = [8, 32], strides = [1, 1]} : vector<8x128xf32> to vector<8x32xf32>
    %281 = arith.mulf %280, %238 : vector<8x32xf32>
    %282 = vector.extract_strided_slice %278 {offsets = [0, 0], sizes = [8, 32], strides = [1, 1]} : vector<8x128xf32> to vector<8x32xf32>
    %283 = vector.extract_strided_slice %279 {offsets = [0, 64], sizes = [8, 32], strides = [1, 1]} : vector<8x128xf32> to vector<8x32xf32>
    %284 = arith.mulf %282, %283 : vector<8x32xf32>
    %285 = arith.addf %281, %284 : vector<8x32xf32>
    %286 = vector.extract_strided_slice %278 {offsets = [0, 96], sizes = [8, 32], strides = [1, 1]} : vector<8x128xf32> to vector<8x32xf32>
    %287 = math.tanh %285 : vector<8x32xf32>
    %288 = arith.mulf %286, %287 : vector<8x32xf32>
    %cst_77 = arith.constant dense<0.000000e+00> : vector<8x128xf32>
    %289 = tpu.matmul %288, %17, %cst_77 {dimension_numbers = #tpu.dot_dimension_numbers<[1], [0], [0], [1], [0, 0, 1, 1], [], []>} : vector<8x32xf32>, vector<32x128xf32>, vector<8x128xf32> -> vector<8x128xf32>
    %cst_78 = arith.constant dense<0.000000e+00> : vector<8x128xf32>
    %290 = tpu.matmul %260, %19, %cst_78 {dimension_numbers = #tpu.dot_dimension_numbers<[1], [0], [0], [1], [0, 0, 1, 1], [], []>} : vector<8x32xf32>, vector<32x128xf32>, vector<8x128xf32> -> vector<8x128xf32>
    %291 = arith.addf %289, %290 : vector<8x128xf32>
    %292 = arith.addf %291, %22 : vector<8x128xf32>
    %293 = arith.negf %292 : vector<8x128xf32>
    %294 = math.exp %293 : vector<8x128xf32>
    %cst_79 = arith.constant 1.000000e+00 : f32
    %295 = vector.broadcast %cst_79 : f32 to vector<8x128xf32>
    %296 = arith.addf %295, %294 : vector<8x128xf32>
    %297 = arith.divf %295, %296 : vector<8x128xf32>
    %298 = math.tanh %292 : vector<8x128xf32>
    %299 = vector.extract_strided_slice %297 {offsets = [0, 32], sizes = [8, 32], strides = [1, 1]} : vector<8x128xf32> to vector<8x32xf32>
    %300 = arith.mulf %299, %257 : vector<8x32xf32>
    %301 = vector.extract_strided_slice %297 {offsets = [0, 0], sizes = [8, 32], strides = [1, 1]} : vector<8x128xf32> to vector<8x32xf32>
    %302 = vector.extract_strided_slice %298 {offsets = [0, 64], sizes = [8, 32], strides = [1, 1]} : vector<8x128xf32> to vector<8x32xf32>
    %303 = arith.mulf %301, %302 : vector<8x32xf32>
    %304 = arith.addf %300, %303 : vector<8x32xf32>
    %305 = vector.extract_strided_slice %297 {offsets = [0, 96], sizes = [8, 32], strides = [1, 1]} : vector<8x128xf32> to vector<8x32xf32>
    %306 = math.tanh %304 : vector<8x32xf32>
    %307 = arith.mulf %305, %306 : vector<8x32xf32>
    %cst_80 = arith.constant dense<0.000000e+00> : vector<8x40xf32>
    %308 = tpu.matmul %307, %20, %cst_80 {dimension_numbers = #tpu.dot_dimension_numbers<[1], [0], [0], [1], [0, 0, 1, 1], [], []>} : vector<8x32xf32>, vector<32x40xf32>, vector<8x40xf32> -> vector<8x40xf32>
    %309 = arith.addf %308, %23 : vector<8x40xf32>
    %310 = vector.extract_strided_slice %309 {offsets = [0, 0], sizes = [8, 32], strides = [1, 1]} : vector<8x40xf32> to vector<8x32xf32>
    %311 = vector.extract_strided_slice %309 {offsets = [0, 32], sizes = [8, 8], strides = [1, 1]} : vector<8x40xf32> to vector<8x8xf32>
    %c5 = arith.constant 5 : index
    %c0_81 = arith.constant 0 : index
    %c0_82 = arith.constant 0 : index
    %312 = vector.load %arg3[%c5, %c0_81, %c0_82] : memref<8x8x8xf32, #tpu.memory_space<vmem>>, vector<1x8x8xf32>
    %313 = vector.shape_cast %312 : vector<1x8x8xf32> to vector<8x8xf32>
    %314 = vector.shape_cast %311 : vector<8x8xf32> to vector<1x8x8xf32>
    tpu.vector_store %arg3[%c5, %c0_81, %c0_82], %314 {strides = array<i32>} : memref<8x8x8xf32, #tpu.memory_space<vmem>>, vector<1x8x8xf32>,
    %315 = vector.extract_strided_slice %15 {offsets = [48, 0], sizes = [8, 32], strides = [1, 1]} : vector<64x32xf32> to vector<8x32xf32>
    %316 = arith.addf %315, %310 : vector<8x32xf32>
    %cst_83 = arith.constant dense<0.000000e+00> : vector<8x128xf32>
    %317 = tpu.matmul %316, %16, %cst_83 {dimension_numbers = #tpu.dot_dimension_numbers<[1], [0], [0], [1], [0, 0, 1, 1], [], []>} : vector<8x32xf32>, vector<32x128xf32>, vector<8x128xf32> -> vector<8x128xf32>
    %cst_84 = arith.constant dense<0.000000e+00> : vector<8x128xf32>
    %318 = tpu.matmul %288, %18, %cst_84 {dimension_numbers = #tpu.dot_dimension_numbers<[1], [0], [0], [1], [0, 0, 1, 1], [], []>} : vector<8x32xf32>, vector<32x128xf32>, vector<8x128xf32> -> vector<8x128xf32>
    %319 = arith.addf %317, %318 : vector<8x128xf32>
    %320 = arith.addf %319, %21 : vector<8x128xf32>
    %321 = arith.negf %320 : vector<8x128xf32>
    %322 = math.exp %321 : vector<8x128xf32>
    %cst_85 = arith.constant 1.000000e+00 : f32
    %323 = vector.broadcast %cst_85 : f32 to vector<8x128xf32>
    %324 = arith.addf %323, %322 : vector<8x128xf32>
    %325 = arith.divf %323, %324 : vector<8x128xf32>
    %326 = math.tanh %320 : vector<8x128xf32>
    %327 = vector.extract_strided_slice %325 {offsets = [0, 32], sizes = [8, 32], strides = [1, 1]} : vector<8x128xf32> to vector<8x32xf32>
    %328 = arith.mulf %327, %285 : vector<8x32xf32>
    %329 = vector.extract_strided_slice %325 {offsets = [0, 0], sizes = [8, 32], strides = [1, 1]} : vector<8x128xf32> to vector<8x32xf32>
    %330 = vector.extract_strided_slice %326 {offsets = [0, 64], sizes = [8, 32], strides = [1, 1]} : vector<8x128xf32> to vector<8x32xf32>
    %331 = arith.mulf %329, %330 : vector<8x32xf32>
    %332 = arith.addf %328, %331 : vector<8x32xf32>
    %333 = vector.extract_strided_slice %325 {offsets = [0, 96], sizes = [8, 32], strides = [1, 1]} : vector<8x128xf32> to vector<8x32xf32>
    %334 = math.tanh %332 : vector<8x32xf32>
    %335 = arith.mulf %333, %334 : vector<8x32xf32>
    %cst_86 = arith.constant dense<0.000000e+00> : vector<8x128xf32>
    %336 = tpu.matmul %335, %17, %cst_86 {dimension_numbers = #tpu.dot_dimension_numbers<[1], [0], [0], [1], [0, 0, 1, 1], [], []>} : vector<8x32xf32>, vector<32x128xf32>, vector<8x128xf32> -> vector<8x128xf32>
    %cst_87 = arith.constant dense<0.000000e+00> : vector<8x128xf32>
    %337 = tpu.matmul %307, %19, %cst_87 {dimension_numbers = #tpu.dot_dimension_numbers<[1], [0], [0], [1], [0, 0, 1, 1], [], []>} : vector<8x32xf32>, vector<32x128xf32>, vector<8x128xf32> -> vector<8x128xf32>
    %338 = arith.addf %336, %337 : vector<8x128xf32>
    %339 = arith.addf %338, %22 : vector<8x128xf32>
    %340 = arith.negf %339 : vector<8x128xf32>
    %341 = math.exp %340 : vector<8x128xf32>
    %cst_88 = arith.constant 1.000000e+00 : f32
    %342 = vector.broadcast %cst_88 : f32 to vector<8x128xf32>
    %343 = arith.addf %342, %341 : vector<8x128xf32>
    %344 = arith.divf %342, %343 : vector<8x128xf32>
    %345 = math.tanh %339 : vector<8x128xf32>
    %346 = vector.extract_strided_slice %344 {offsets = [0, 32], sizes = [8, 32], strides = [1, 1]} : vector<8x128xf32> to vector<8x32xf32>
    %347 = arith.mulf %346, %304 : vector<8x32xf32>
    %348 = vector.extract_strided_slice %344 {offsets = [0, 0], sizes = [8, 32], strides = [1, 1]} : vector<8x128xf32> to vector<8x32xf32>
    %349 = vector.extract_strided_slice %345 {offsets = [0, 64], sizes = [8, 32], strides = [1, 1]} : vector<8x128xf32> to vector<8x32xf32>
    %350 = arith.mulf %348, %349 : vector<8x32xf32>
    %351 = arith.addf %347, %350 : vector<8x32xf32>
    %352 = vector.extract_strided_slice %344 {offsets = [0, 96], sizes = [8, 32], strides = [1, 1]} : vector<8x128xf32> to vector<8x32xf32>
    %353 = math.tanh %351 : vector<8x32xf32>
    %354 = arith.mulf %352, %353 : vector<8x32xf32>
    %cst_89 = arith.constant dense<0.000000e+00> : vector<8x40xf32>
    %355 = tpu.matmul %354, %20, %cst_89 {dimension_numbers = #tpu.dot_dimension_numbers<[1], [0], [0], [1], [0, 0, 1, 1], [], []>} : vector<8x32xf32>, vector<32x40xf32>, vector<8x40xf32> -> vector<8x40xf32>
    %356 = arith.addf %355, %23 : vector<8x40xf32>
    %357 = vector.extract_strided_slice %356 {offsets = [0, 0], sizes = [8, 32], strides = [1, 1]} : vector<8x40xf32> to vector<8x32xf32>
    %358 = vector.extract_strided_slice %356 {offsets = [0, 32], sizes = [8, 8], strides = [1, 1]} : vector<8x40xf32> to vector<8x8xf32>
    %c6 = arith.constant 6 : index
    %c0_90 = arith.constant 0 : index
    %c0_91 = arith.constant 0 : index
    %359 = vector.load %arg3[%c6, %c0_90, %c0_91] : memref<8x8x8xf32, #tpu.memory_space<vmem>>, vector<1x8x8xf32>
    %360 = vector.shape_cast %359 : vector<1x8x8xf32> to vector<8x8xf32>
    %361 = vector.shape_cast %358 : vector<8x8xf32> to vector<1x8x8xf32>
    tpu.vector_store %arg3[%c6, %c0_90, %c0_91], %361 {strides = array<i32>} : memref<8x8x8xf32, #tpu.memory_space<vmem>>, vector<1x8x8xf32>,
    %362 = vector.extract_strided_slice %15 {offsets = [56, 0], sizes = [8, 32], strides = [1, 1]} : vector<64x32xf32> to vector<8x32xf32>
    %363 = arith.addf %362, %357 : vector<8x32xf32>
    %cst_92 = arith.constant dense<0.000000e+00> : vector<8x128xf32>
    %364 = tpu.matmul %363, %16, %cst_92 {dimension_numbers = #tpu.dot_dimension_numbers<[1], [0], [0], [1], [0, 0, 1, 1], [], []>} : vector<8x32xf32>, vector<32x128xf32>, vector<8x128xf32> -> vector<8x128xf32>
    %cst_93 = arith.constant dense<0.000000e+00> : vector<8x128xf32>
    %365 = tpu.matmul %335, %18, %cst_93 {dimension_numbers = #tpu.dot_dimension_numbers<[1], [0], [0], [1], [0, 0, 1, 1], [], []>} : vector<8x32xf32>, vector<32x128xf32>, vector<8x128xf32> -> vector<8x128xf32>
    %366 = arith.addf %364, %365 : vector<8x128xf32>
    %367 = arith.addf %366, %21 : vector<8x128xf32>
    %368 = arith.negf %367 : vector<8x128xf32>
    %369 = math.exp %368 : vector<8x128xf32>
    %cst_94 = arith.constant 1.000000e+00 : f32
    %370 = vector.broadcast %cst_94 : f32 to vector<8x128xf32>
    %371 = arith.addf %370, %369 : vector<8x128xf32>
    %372 = arith.divf %370, %371 : vector<8x128xf32>
    %373 = math.tanh %367 : vector<8x128xf32>
    %374 = vector.extract_strided_slice %372 {offsets = [0, 32], sizes = [8, 32], strides = [1, 1]} : vector<8x128xf32> to vector<8x32xf32>
    %375 = arith.mulf %374, %332 : vector<8x32xf32>
    %376 = vector.extract_strided_slice %372 {offsets = [0, 0], sizes = [8, 32], strides = [1, 1]} : vector<8x128xf32> to vector<8x32xf32>
    %377 = vector.extract_strided_slice %373 {offsets = [0, 64], sizes = [8, 32], strides = [1, 1]} : vector<8x128xf32> to vector<8x32xf32>
    %378 = arith.mulf %376, %377 : vector<8x32xf32>
    %379 = arith.addf %375, %378 : vector<8x32xf32>
    %380 = vector.extract_strided_slice %372 {offsets = [0, 96], sizes = [8, 32], strides = [1, 1]} : vector<8x128xf32> to vector<8x32xf32>
    %381 = math.tanh %379 : vector<8x32xf32>
    %382 = arith.mulf %380, %381 : vector<8x32xf32>
    %cst_95 = arith.constant dense<0.000000e+00> : vector<8x128xf32>
    %383 = tpu.matmul %382, %17, %cst_95 {dimension_numbers = #tpu.dot_dimension_numbers<[1], [0], [0], [1], [0, 0, 1, 1], [], []>} : vector<8x32xf32>, vector<32x128xf32>, vector<8x128xf32> -> vector<8x128xf32>
    %cst_96 = arith.constant dense<0.000000e+00> : vector<8x128xf32>
    %384 = tpu.matmul %354, %19, %cst_96 {dimension_numbers = #tpu.dot_dimension_numbers<[1], [0], [0], [1], [0, 0, 1, 1], [], []>} : vector<8x32xf32>, vector<32x128xf32>, vector<8x128xf32> -> vector<8x128xf32>
    %385 = arith.addf %383, %384 : vector<8x128xf32>
    %386 = arith.addf %385, %22 : vector<8x128xf32>
    %387 = arith.negf %386 : vector<8x128xf32>
    %388 = math.exp %387 : vector<8x128xf32>
    %cst_97 = arith.constant 1.000000e+00 : f32
    %389 = vector.broadcast %cst_97 : f32 to vector<8x128xf32>
    %390 = arith.addf %389, %388 : vector<8x128xf32>
    %391 = arith.divf %389, %390 : vector<8x128xf32>
    %392 = math.tanh %386 : vector<8x128xf32>
    %393 = vector.extract_strided_slice %391 {offsets = [0, 32], sizes = [8, 32], strides = [1, 1]} : vector<8x128xf32> to vector<8x32xf32>
    %394 = arith.mulf %393, %351 : vector<8x32xf32>
    %395 = vector.extract_strided_slice %391 {offsets = [0, 0], sizes = [8, 32], strides = [1, 1]} : vector<8x128xf32> to vector<8x32xf32>
    %396 = vector.extract_strided_slice %392 {offsets = [0, 64], sizes = [8, 32], strides = [1, 1]} : vector<8x128xf32> to vector<8x32xf32>
    %397 = arith.mulf %395, %396 : vector<8x32xf32>
    %398 = arith.addf %394, %397 : vector<8x32xf32>
    %399 = vector.extract_strided_slice %391 {offsets = [0, 96], sizes = [8, 32], strides = [1, 1]} : vector<8x128xf32> to vector<8x32xf32>
    %400 = math.tanh %398 : vector<8x32xf32>
    %401 = arith.mulf %399, %400 : vector<8x32xf32>
    %cst_98 = arith.constant dense<0.000000e+00> : vector<8x40xf32>
    %402 = tpu.matmul %401, %20, %cst_98 {dimension_numbers = #tpu.dot_dimension_numbers<[1], [0], [0], [1], [0, 0, 1, 1], [], []>} : vector<8x32xf32>, vector<32x40xf32>, vector<8x40xf32> -> vector<8x40xf32>
    %403 = arith.addf %402, %23 : vector<8x40xf32>
    %404 = vector.extract_strided_slice %403 {offsets = [0, 32], sizes = [8, 8], strides = [1, 1]} : vector<8x40xf32> to vector<8x8xf32>
    %c7 = arith.constant 7 : index
    %c0_99 = arith.constant 0 : index
    %c0_100 = arith.constant 0 : index
    %405 = vector.load %arg3[%c7, %c0_99, %c0_100] : memref<8x8x8xf32, #tpu.memory_space<vmem>>, vector<1x8x8xf32>
    %406 = vector.shape_cast %405 : vector<1x8x8xf32> to vector<8x8xf32>
    %407 = vector.shape_cast %404 : vector<8x8xf32> to vector<1x8x8xf32>
    tpu.vector_store %arg3[%c7, %c0_99, %c0_100], %407 {strides = array<i32>} : memref<8x8x8xf32, #tpu.memory_space<vmem>>, vector<1x8x8xf32>,
    %c0_101 = arith.constant 0 : index
    %c0_102 = arith.constant 0 : index
    %c0_103 = arith.constant 0 : index
    %408 = vector.load %arg4[%c0_101, %c0_102, %c0_103] : memref<4x8x32xf32, #tpu.memory_space<vmem>>, vector<1x8x32xf32>
    %409 = vector.shape_cast %408 : vector<1x8x32xf32> to vector<8x32xf32>
    %410 = vector.shape_cast %382 : vector<8x32xf32> to vector<1x8x32xf32>
    tpu.vector_store %arg4[%c0_101, %c0_102, %c0_103], %410 {strides = array<i32>} : memref<4x8x32xf32, #tpu.memory_space<vmem>>, vector<1x8x32xf32>,
    %c2_104 = arith.constant 2 : index
    %c0_105 = arith.constant 0 : index
    %c0_106 = arith.constant 0 : index
    %411 = vector.load %arg4[%c2_104, %c0_105, %c0_106] : memref<4x8x32xf32, #tpu.memory_space<vmem>>, vector<1x8x32xf32>
    %412 = vector.shape_cast %411 : vector<1x8x32xf32> to vector<8x32xf32>
    %413 = vector.shape_cast %379 : vector<8x32xf32> to vector<1x8x32xf32>
    tpu.vector_store %arg4[%c2_104, %c0_105, %c0_106], %413 {strides = array<i32>} : memref<4x8x32xf32, #tpu.memory_space<vmem>>, vector<1x8x32xf32>,
    %c1_107 = arith.constant 1 : index
    %c0_108 = arith.constant 0 : index
    %c0_109 = arith.constant 0 : index
    %414 = vector.load %arg4[%c1_107, %c0_108, %c0_109] : memref<4x8x32xf32, #tpu.memory_space<vmem>>, vector<1x8x32xf32>
    %415 = vector.shape_cast %414 : vector<1x8x32xf32> to vector<8x32xf32>
    %416 = vector.shape_cast %401 : vector<8x32xf32> to vector<1x8x32xf32>
    tpu.vector_store %arg4[%c1_107, %c0_108, %c0_109], %416 {strides = array<i32>} : memref<4x8x32xf32, #tpu.memory_space<vmem>>, vector<1x8x32xf32>,
    %c3_110 = arith.constant 3 : index
    %c0_111 = arith.constant 0 : index
    %c0_112 = arith.constant 0 : index
    %417 = vector.load %arg4[%c3_110, %c0_111, %c0_112] : memref<4x8x32xf32, #tpu.memory_space<vmem>>, vector<1x8x32xf32>
    %418 = vector.shape_cast %417 : vector<1x8x32xf32> to vector<8x32xf32>
    %419 = vector.shape_cast %398 : vector<8x32xf32> to vector<1x8x32xf32>
    tpu.vector_store %arg4[%c3_110, %c0_111, %c0_112], %419 {strides = array<i32>} : memref<4x8x32xf32, #tpu.memory_space<vmem>>, vector<1x8x32xf32>,
    return
  }
}

</mosaic_0001>

<bundles_post_ra>
// kernel: wav_codec_dequantize.1
= control target key start
LH: loop header
LB: loop body
LE: loop exit
PB: predicated region body
PF: predicated region fallthrough
CT: control target
= control target key end

     0   :  { %10 = vsyncpa [#allocation3], 0  ;;  %s4939_s15 = smov [#allocation2]   ;;  %s5638_s0 = inlined_call_operand.vmem [shape: s32[2,64,1], index: 0, kind: input, shape index: {}]   ;;  %s5639_s1 = inlined_call_operand.hbm [shape: f32[320,128], index: 1, kind: input, shape index: {}]   ;;  %s5640_s2 = inlined_call_operand.vmem [shape: f32[4,8,32], index: 2, kind: input, shape index: {}]   ;;  %s5641_s3 = inlined_call_operand.vmem [shape: f32[8,8,8], index: 3, kind: output, shape index: {0}]   ;;  %s5642_s4 = inlined_call_operand.vmem [shape: f32[4,8,32], index: 4, kind: output, shape index: {1}]  }
   0x1   :  { %s18_s16 = sshll.u32 %s4939_s15, 4  ;;  %s4915_s19 = scalar_lea.hbm %s5639_s1, 5120  ;;  %s19_s16 = int_to_ptr.vmem [resolvable:$true] %s18_s16 }
   0x2   :  { %p4916_p0 = scmp.ne.s32.totalorder %s5639_s1, %s4915_s19  ;;  %p4919_p1 = scmp.lt.u32.totalorder %s4915_s19, %s5639_s1 }
   0x4   :  { %p4921_p2 = pnand %p4919_p1, %p4916_p0 }
   0x6   :  { %4924 = shalt.err (!%p4921_p2)
}
   0x7   :  { %s4925_s24 = scalar_lea.vmem %s19_s16, 5120  ;;  %p4930_p4 = scmp.lt.s32.totalorder %s19_s16, %s19_s16 }
   0x8   :  { %p4926_p3 = scmp.ne.s32.totalorder %s19_s16, %s4925_s24  ;;  %p4931_p5 = scmp.lt.s32.totalorder %s4925_s24, %s4925_s24 }
   0xa   :  { %p4932_p6 = por %p4931_p5, %p4930_p4 }
   0xc   :  { %p4933_p7 = pnand %p4932_p6, %p4926_p3 }
   0xe   :  { %4936 = shalt.err (!%p4933_p7)
}
   0xf   :  { %s4940_s25 = smov 128   ;;  %s4941_s26 = smov 8  }
  0x10   :  { %24 = dma.hbm_to_vmem [thread:$0]  %s5639_s1, 5120, %s19_s16, [#allocation3], %s4940_s25, %s4940_s25, %s4941_s26  }
  0x11   :  { %4937 = dma.done.wait [#allocation3], 5120  }
  0x12   :  { %4938 = vsyncadd [#allocation3], 4294962176  ;;  %v4942_v0 = vmov 0   ;;  %v33_v1 = vld [vmem:[%s5638_s0 + $0x8] sm:$0xff]  ;;  %v32_v2 = vld [vmem:[%s5638_s0] sm:$0xff]  ;;  %v4943_v21 = vmov 0.0|0.0   ;;  %v30_v43 = vlaneseq }
  0x13   :  { %4783 = vset.pattern.permute.xlu1 %v4942_v0  ;;  %4782 = vset.pattern.permute.xlu0 %v4942_v0  ;;  %v3699_v3 = vld [vmem:[%s5638_s0 + $0x48] sm:$0xff]  ;;  %v3698_v5 = vld [vmem:[%s5638_s0 + $0x40] sm:$0xff]  ;;  %v147_v10 = vld [vmem:[#allocation2 + $0x10] sm:$0xff]  ;;  %vm4944_vm0 = vmmov 0   ;;  %v4945_v25 = vmov 0.0   ;;  %vm298_vm1 = vcmask 261120  }
  0x14   :  { %44 = vperm.xlu1 %4783, %v33_v1   ;;  %41 = vperm.xlu0 %4782, %v32_v2   ;;  %v82_v4 = vadd.s32 64, %v3699_v3  ;;  %v145_v6 = vld [vmem:[#allocation2] sm:$0xff]  ;;  %v146_v7 = vld [vmem:[#allocation2 + $0x8] sm:$0xff]  ;;  %v81_v8 = vadd.s32 64, %v3698_v5  ;;  %v148_v11 = vld [vmem:[#allocation2 + $0x18] sm:$0xff]  ;;  %v5021_v46 = vand.u32 127, %v30_v43 }
  0x15   :  { %v4499_v9 = vpack.c.bf16 %v146_v7, %v145_v6  ;;  %v4503_v12 = vpack.c.bf16 %v148_v11, %v147_v10  ;;  %v149_v13 = vld [vmem:[#allocation2 + $0x20] sm:$0xff]  ;;  %v150_v14 = vld [vmem:[#allocation2 + $0x28] sm:$0xff]  ;;  %v151_v16 = vld [vmem:[#allocation2 + $0x30] sm:$0xff]  ;;  %4531 = vmatprep.subr.bf16.mxu1 %v4943_v21  ;;  %4067 = vmatprep.mubr.msk.f32.mxu1 %vm4944_vm0, %v4945_v25  ;;  %v4946_v49 = vmov 1.0   ;;  %s4947_s14 = smov 32   ;;  %s4948_s15 = smov 64  }
  0x16   :  { %v4507_v15 = vpack.c.bf16 %v150_v14, %v149_v13  ;;  %v152_v17 = vld [vmem:[#allocation2 + $0x38] sm:$0xff]  ;;  %v274_v18 = vld [vmem:[#allocation2 + $0xc0] sm:$0xff]  ;;  %v275_v19 = vld [vmem:[#allocation2 + $0xc8] sm:$0xff]  ;;  %s4949_s19 = smov 96  }
  0x17   :  { %4500 = vmatprep.subr.bf16.mxu0 %v4499_v9  ;;  %v276_v20 = vld [vmem:[#allocation2 + $0xd0] sm:$0xff]  ;;  %v5000_v22 = vpack.c.bf16 %v275_v19, %v274_v18  ;;  %v277_v23 = vld [vmem:[#allocation2 + $0xd8] sm:$0xff]  ;;  %v4511_v24 = vpack.c.bf16 %v152_v17, %v151_v16  ;;  %v153_v26 = vld [vmem:[#allocation2 + $0x40] sm:$0xff] }
  0x18   :  { %93 = vperm.xlu1 %4783, %v82_v4   ;;  %90 = vperm.xlu0 %4782, %v81_v8   ;;  %v154_v27 = vld [vmem:[#allocation2 + $0x48] sm:$0xff]  ;;  %v5005_v28 = vpack.c.bf16 %v277_v23, %v276_v20  ;;  %v266_v29 = vld [vmem:[#allocation2 + $0x80] sm:$0xff]  ;;  %v155_v32 = vld [vmem:[#allocation2 + $0x50] sm:$0xff] }
  0x19   :  { %4502 = vmatpush3.bf16.msra.mxu0 %v4499_v9  ;;  %4533 = vmatpush3.bf16.msra.mxu1 %v5000_v22  ;;  %v267_v30 = vld [vmem:[#allocation2 + $0x88] sm:$0xff]  ;;  %v4515_v31 = vpack.c.bf16 %v154_v27, %v153_v26  ;;  %v156_v33 = vld [vmem:[#allocation2 + $0x58] sm:$0xff]  ;;  %v290_v34 = vld [vmem:[%s5640_s2] sm:$0xff] }
  0x1a   :  { %4504 = vmatprep.subr.bf16.mxu0 %v4503_v12  ;;  %4534 = vmatprep.subr.bf16.mxu1 %v4943_v21  ;;  %v5012_v35 = vpack.c.bf16 %v267_v30, %v266_v29  ;;  %v4519_v36 = vpack.c.bf16 %v156_v33, %v155_v32  ;;  %v157_v37 = vld [vmem:[#allocation2 + $0x60] sm:$0xff]  ;;  %v158_v38 = vld [vmem:[#allocation2 + $0x68] sm:$0xff]  ;;  %v159_v40 = vld [vmem:[#allocation2 + $0x70] sm:$0xff] }
  0x1b   :  { %v4523_v39 = vpack.c.bf16 %v158_v38, %v157_v37  ;;  %v160_v41 = vld [vmem:[#allocation2 + $0x78] sm:$0xff]  ;;  %v268_v50 = vld [vmem:[#allocation2 + $0x90] sm:$0xff]  ;;  %v5046_v60 = vld [vmem:[#allocation2 + $0x100] sm:$0xff] }
  0x1c   :  { %v4527_v42 = vpack.c.bf16 %v160_v41, %v159_v40  ;;  %v269_v51 = vld [vmem:[#allocation2 + $0x98] sm:$0xff]  ;;  %v3723_v53 = vld [vmem:[%s5640_s2 + $0x10] sm:$0xff]  ;;  %v279_v13 = vld [vmem:[#allocation2 + $0xe8] sm:$0xff] }
  0x1d   :  { %4506 = vmatpush3.bf16.msra.mxu0 %v4503_v12  ;;  %4536 = vmatpush3.bf16.msra.mxu1 %v5005_v28  ;;  %v5033_v52 = vpack.c.bf16 %v269_v51, %v268_v50  ;;  %v289_v56 = vld [vmem:[#allocation2 + $0x138] sm:$0xff]  ;;  %v278_v12 = vld [vmem:[#allocation2 + $0xe0] sm:$0xff]  ;;  %v280_v14 = vld [vmem:[#allocation2 + $0xf0] sm:$0xff] }
  0x1e   :  { %4508 = vmatprep.subr.bf16.mxu0 %v4507_v15  ;;  %4537 = vmatprep.subr.bf16.mxu1 %v4943_v21  ;;  %v281_v16 = vld [vmem:[#allocation2 + $0xf8] sm:$0xff]  ;;  %v270_v18 = vld [vmem:[#allocation2 + $0xa0] sm:$0xff]  ;;  %v271_v19 = vld [vmem:[#allocation2 + $0xa8] sm:$0xff] }
  0x1f   :  { %454 = vrot.lane.b32.xlu1 %v3723_v53, %s4947_s14  ;;  %v5057_v17 = vpack.c.bf16 %v281_v16, %v280_v14  ;;  %v3722_v20 = vld [vmem:[%s5640_s2 + $0x8] sm:$0xff]  ;;  %v5064_v23 = vpack.c.bf16 %v271_v19, %v270_v18  ;;  %v273_v26 = vld [vmem:[#allocation2 + $0xb8] sm:$0xff]  ;;  %v3702_v14 = vld [vmem:[%s5638_s0 + $0x60] sm:$0xff] }
  0x20   :  { %4068 = vmatmul.mubr.msk.f32.vlgmr.msra.gmra.mrb[0].mxu1 %vm298_vm1, %v290_v34  ;;  %v3724_v32 = vld [vmem:[%s5640_s2 + $0x18] sm:$0xff]  ;;  %v5088_v37 = vld [vmem:[#allocation2 + $0x108] sm:$0xff]  ;;  %v85_v16 = vadd.s32 64, %v3702_v14 }
  0x21   :  { %4510 = vmatpush3.bf16.msra.mxu0 %v4507_v15  ;;  %4539 = vmatpush3.bf16.msra.mxu1 %v5012_v35  ;;  %v5054_v15 = vpack.c.bf16 %v279_v13, %v278_v12  ;;  %v3701_v12 = vld [vmem:[%s5638_s0 + $0x58] sm:$0xff]  ;;  %v3703_v18 = vld [vmem:[%s5638_s0 + $0x68] sm:$0xff] }
  0x22   :  { %4512 = vmatprep.subr.bf16.mxu0 %v4511_v24  ;;  %4078 = vmatprep.mubr.msk.f32.mxu1 %vm4944_vm0, %v4945_v25  ;;  %v84_v13 = vadd.s32 64, %v3701_v12  ;;  %v86_v19 = vadd.s32 64, %v3703_v18 }
  0x23   :  { %4540 = vmatprep.subr.bf16.mxu1 %v4943_v21 }
  0x25   :  { %4514 = vmatpush3.bf16.msra.mxu0 %v4511_v24  ;;  %4542 = vmatpush3.bf16.msra.mxu1 %v5033_v52  ;;  %v272_v24 = vld [vmem:[#allocation2 + $0xb0] sm:$0xff] }
  0x26   :  { %4516 = vmatprep.subr.bf16.mxu0 %v4515_v31  ;;  %4543 = vmatprep.subr.bf16.mxu1 %v4943_v21  ;;  %v5070_v29 = vpack.c.bf16 %v273_v26, %v272_v24  ;;  %v3705_v26 = vld [vmem:[%s5638_s0 + $0x78] sm:$0xff] }
  0x29   :  { %4518 = vmatpush3.bf16.msra.mxu0 %v4515_v31 }
  0x2a   :  { %4520 = vmatprep.subr.bf16.mxu0 %v4519_v36 }
  0x2d   :  { %4522 = vmatpush3.bf16.msra.mxu0 %v4519_v36 }
  0x2e   :  { %4524 = vmatprep.subr.bf16.mxu0 %v4523_v39 }
  0x31   :  { %4526 = vmatpush3.bf16.msra.mxu0 %v4523_v39 }
  0x32   :  { %4528 = vmatprep.subr.bf16.mxu0 %v4527_v42 }
  0x35   :  { %4530 = vmatpush3.bf16.msra.mxu0 %v4527_v42 }
  0x36   :  { %4561 = vmatprep.subr.bf16.mxu0 %v4943_v21 }
  0x93   :  { %v45_v44 = vpop.permute.xlu1 %44  ;;  %v42_v45 = vpop.permute.xlu0 %41 }
  0x94   :  { %vm65_vm2 = vcmp.eq.s32.totalorder %v5021_v46, %v45_v44  ;;  %vm64_vm5 = vcmp.eq.s32.totalorder %v5021_v46, %v42_v45 }
  0x97   :  { %v94_v47 = vpop.permute.xlu1 %93  ;;  %v91_v48 = vpop.permute.xlu0 %90 }
  0x98   :  { %vm114_vm3 = vcmp.eq.s32.totalorder %v5021_v46, %v94_v47  ;;  %vm113_vm4 = vcmp.eq.s32.totalorder %v5021_v46, %v91_v48 }
  0x99   :  { %vm122_vm6 = vmor %vm65_vm2, %vm114_vm3 }
  0x9a   :  { %vm121_vm7 = vmor %vm64_vm5, %vm113_vm4 }
  0x9b   :  { %4047 = vmatprep.mubr.msk.f32.mxu0 %vm121_vm7, %v4946_v49  ;;  %v455_v8 = vpop.permute.xlu1 %454 }
  0x9c   :  { %4048 = vmatmul.mubr.msk.f32.vlgmr.msra.gmra.mrb[0].mxu0 %vm122_vm6, %v4946_v49 }
  0x9d   :  { %4563 = vmatpush3.bf16.msra.mxu0 %v5000_v22 }
  0x9e   :  { %4564 = vmatprep.subr.bf16.mxu0 %v4943_v21 }
  0xa1   :  { %4566 = vmatpush3.bf16.msra.mxu0 %v5005_v28 }
  0xa2   :  { %4573 = vmatprep.subr.bf16.mxu0 %v4943_v21 }
  0xf3   :  { %v368_v54 = vpop.f32.mrb[0].mxu1 }
  0xf4   :  { %v4069_v55 = vpop.f32.mrb[1].mxu1 }
 0x16f   :  { %v5041_v57 = vpop.f32.mrb[0].mxu0 }
 0x170   :  { %v227_v58 = vpop.f32.mrb[1].mxu0 }
 0x171   :  { %v297_v59 = vadd.f32 %v289_v56, %v227_v58  ;;  %v34_v58 = vld [vmem:[%s5638_s0 + $0x10] sm:$0xff] }
 0x173   :  { %4079 = vmatmul.mubr.msk.f32.vlgmr.msra.gmra.mrb[2].mxu1 %vm298_vm1, %v297_v59  ;;  %v35_v59 = vld [vmem:[%s5638_s0 + $0x18] sm:$0xff] }
 0x174   :  { %4089 = vmatprep.mubr.msk.f32.mxu1 %vm4944_vm0, %v4945_v25  ;;  %4545 = vmatpush3.bf16.msra.mxu1 %v5054_v15 }
 0x175   :  { %4546 = vmatprep.subr.bf16.mxu1 %v4943_v21 }
 0x178   :  { %4548 = vmatpush3.bf16.msra.mxu1 %v5057_v17 }
 0x179   :  { %4549 = vmatprep.subr.bf16.mxu1 %v4943_v21 }
 0x17b   :  { %4090 = vmatmul.mubr.msk.f32.vlgmr.msra.gmra.mrb[4].mxu1 %vm298_vm1, %v3722_v20  ;;  %v3704_v20 = vld [vmem:[%s5638_s0 + $0x70] sm:$0xff] }
 0x17c   :  { %4551 = vmatpush3.bf16.msra.mxu1 %v5064_v23  ;;  %4100 = vmatprep.mubr.msk.f32.mxu1 %vm4944_vm0, %v4945_v25  ;;  %v87_v24 = vadd.s32 64, %v3704_v20 }
 0x17d   :  { %4552 = vmatprep.subr.bf16.mxu1 %v4943_v21 }
 0x180   :  { %4554 = vmatpush3.bf16.msra.mxu1 %v5070_v29 }
 0x181   :  { %4555 = vmatprep.subr.bf16.mxu1 %v4943_v21 }
 0x246   :  { %v441_v61 = vpop.f32.mrb[2].mxu1 }
 0x247   :  { %v442_v62 = vadd.f32 %v441_v61, %v368_v54  ;;  %v4080_v63 = vpop.f32.mrb[3].mxu1  ;;  %v36_v61 = vld [vmem:[%s5638_s0 + $0x20] sm:$0xff] }
 0x248   :  { %v38_v63 = vld [vmem:[%s5638_s0 + $0x30] sm:$0xff] }
 0x249   :  { %v445_v0 = vadd.f32 %v442_v62, %v5046_v60  ;;  %v37_v62 = vld [vmem:[%s5638_s0 + $0x28] sm:$0xff] }
 0x24b   :  { %4784 = vtanh.f32 %v445_v0  ;;  %v3727_v2 = vmul.f32 -1.442695, %v445_v0  ;;  %v39_v0 = vld [vmem:[%s5638_s0 + $0x38] sm:$0xff] }
 0x24d   :  { %4786 = vpow2.f32 %v3727_v2  ;;  %v283_v2 = vld [vmem:[#allocation2 + $0x118] sm:$0xff] }
 0x24e   :  { %v543_v33 = vpop.f32.mrb[4].mxu1 }
 0x24f   :  { %v4091_v34 = vpop.f32.mrb[5].mxu1 }
 0x255   :  { %v4785_v1 = vpop.eup %4784 }
 0x256   :  { %459 = vrot.lane.b32.xlu0 %v4785_v1, %s4948_s15  ;;  %v282_v1 = vld [vmem:[#allocation2 + $0x110] sm:$0xff] }
 0x257   :  { %v4787_v3 = vpop.eup %4786 }
 0x258   :  { %v449_v4 = vadd.f32 1.0, %v4787_v3  ;;  %v284_v3 = vld [vmem:[#allocation2 + $0x120] sm:$0xff] }
 0x25a   :  { %4788 = vrcp.f32 %v449_v4  ;;  %v5115_v4 = vpack.c.bf16 %v283_v2, %v282_v1 }
 0x264   :  { %v4789_v5 = vpop.eup %4788 }
 0x265   :  { %v457_v9 = vmul.f32 %v4789_v5, %v455_v8  ;;  %v3700_v8 = vld [vmem:[%s5638_s0 + $0x50] sm:$0xff] }
 0x2c8   :  { %v460_v6 = vpop.permute.xlu0 %459 }
 0x2c9   :  { %v462_v7 = vmul.f32 %v4789_v5, %v460_v6 }
 0x2cb   :  { %464 = vrot.lane.b32.xlu0 %v462_v7, %s4947_s14 }
 0x33d   :  { %v465_v10 = vpop.permute.xlu0 %464 }
 0x33e   :  { %v5051_v11 = vadd.f32 %v465_v10, %v457_v9  ;;  %v83_v10 = vadd.s32 64, %v3700_v8 }
 0x340   :  { %4790 = vtanh.f32 %v5051_v11 }
 0x34a   :  { %v4791_v27 = vpop.eup %4790 }
 0x34b   :  { %470 = vrot.lane.b32.xlu1 %v4791_v27, %s4948_s15  ;;  %v88_v27 = vadd.s32 64, %v3705_v26 }
 0x3bd   :  { %v471_v30 = vpop.permute.xlu1 %470 }
 0x3be   :  { %v473_v31 = vmul.f32 %v4789_v5, %v471_v30  ;;  %v285_v5 = vld [vmem:[#allocation2 + $0x128] sm:$0xff] }
 0x3bf   :  { %v5118_v6 = vpack.c.bf16 %v285_v5, %v284_v3 }
 0x3c0   :  { %548 = vrot.lane.b32.xlu0 %v473_v31, %s4947_s14 }
 0x3c4   :  { %631 = vrot.lane.b32.xlu0 %v3724_v32, %s4947_s14 }
 0x432   :  { %v5082_v36 = vpop.permute.xlu0 %548 }
 0x433   :  { %4101 = vmatmul.mubr.msk.f32.vlgmr.msra.gmra.mrb[6].mxu1 %vm298_vm1, %v5082_v36 }
 0x434   :  { %4111 = vmatprep.mubr.msk.f32.mxu1 %vm4944_vm0, %v4945_v25  ;;  %4557 = vmatpush3.bf16.msra.mxu1 %v5115_v4 }
 0x435   :  { %4558 = vmatprep.subr.bf16.mxu1 %v4943_v21 }
 0x436   :  { %v632_v51 = vpop.permute.xlu0 %631 }
 0x438   :  { %4560 = vmatpush3.bf16.msra.mxu1 %v5118_v6 }
 0x439   :  { %4567 = vmatprep.subr.bf16.mxu1 %v4943_v21 }
 0x506   :  { %v618_v38 = vpop.f32.mrb[6].mxu1 }
 0x507   :  { %v619_v39 = vadd.f32 %v618_v38, %v543_v33  ;;  %v4102_v40 = vpop.f32.mrb[7].mxu1 }
 0x509   :  { %v622_v41 = vadd.f32 %v619_v39, %v5088_v37 }
 0x50b   :  { %4792 = vtanh.f32 %v622_v41  ;;  %v3730_v43 = vmul.f32 -1.442695, %v622_v41 }
 0x50d   :  { %4794 = vpow2.f32 %v3730_v43 }
 0x515   :  { %v4793_v42 = vpop.eup %4792 }
 0x516   :  { %636 = vrot.lane.b32.xlu1 %v4793_v42, %s4948_s15 }
 0x517   :  { %v4795_v44 = vpop.eup %4794 }
 0x518   :  { %v626_v45 = vadd.f32 1.0, %v4795_v44 }
 0x51a   :  { %4796 = vrcp.f32 %v626_v45 }
 0x524   :  { %v4797_v47 = vpop.eup %4796 }
 0x525   :  { %v634_v53 = vmul.f32 %v4797_v47, %v632_v51 }
 0x588   :  { %v637_v48 = vpop.permute.xlu1 %636 }
 0x589   :  { %v639_v50 = vmul.f32 %v4797_v47, %v637_v48 }
 0x58b   :  { %641 = vrot.lane.b32.xlu1 %v639_v50, %s4947_s14 }
 0x5fd   :  { %v642_v54 = vpop.permute.xlu1 %641 }
 0x5fe   :  { %v5093_v55 = vadd.f32 %v642_v54, %v634_v53 }
 0x600   :  { %4798 = vtanh.f32 %v5093_v55 }
 0x60a   :  { %v4799_v56 = vpop.eup %4798 }
 0x60b   :  { %647 = vrot.lane.b32.xlu0 %v4799_v56, %s4948_s15 }
 0x60f   :  { %47 = vperm.xlu0 %4782, %v34_v58  }
 0x613   :  { %50 = vperm.xlu0 %4782, %v35_v59  }
 0x617   :  { %53 = vperm.xlu0 %4782, %v36_v61  }
 0x61b   :  { %56 = vperm.xlu0 %4782, %v37_v62  }
 0x61f   :  { %59 = vperm.xlu0 %4782, %v38_v63  }
 0x623   :  { %62 = vperm.xlu0 %4782, %v39_v0  }
 0x67d   :  { %v648_v7 = vpop.permute.xlu0 %647 }
 0x67e   :  { %v650_v9 = vmul.f32 %v4797_v47, %v648_v7 }
 0x680   :  { %652 = vrot.lane.b32.xlu1 %v650_v9, %s4947_s14 }
 0x684   :  { %96 = vperm.xlu1 %4783, %v83_v10  }
 0x688   :  { %99 = vperm.xlu1 %4783, %v84_v13  }
 0x68c   :  { %102 = vperm.xlu1 %4783, %v85_v16  }
 0x68e   :  { %v48_v31 = vpop.permute.xlu0 %47 }
 0x68f   :  { %vm66_vm8 = vcmp.eq.s32.totalorder %v5021_v46, %v48_v31 }
 0x690   :  { %105 = vperm.xlu1 %4783, %v86_v19  }
 0x692   :  { %v51_v32 = vpop.permute.xlu0 %50 }
 0x693   :  { %vm67_vm11 = vcmp.eq.s32.totalorder %v5021_v46, %v51_v32 }
 0x694   :  { %108 = vperm.xlu1 %4783, %v87_v24  }
 0x696   :  { %v54_v33 = vpop.permute.xlu0 %53 }
 0x697   :  { %vm68_vm14 = vcmp.eq.s32.totalorder %v5021_v46, %v54_v33 }
 0x698   :  { %111 = vperm.xlu1 %4783, %v88_v27  }
 0x69a   :  { %v57_v39 = vpop.permute.xlu0 %56 }
 0x69b   :  { %vm69_vm3 = vcmp.eq.s32.totalorder %v5021_v46, %v57_v39 }
 0x69e   :  { %v60_v41 = vpop.permute.xlu0 %59 }
 0x69f   :  { %vm70_vm6 = vcmp.eq.s32.totalorder %v5021_v46, %v60_v41 }
 0x6a2   :  { %v63_v44 = vpop.permute.xlu0 %62 }
 0x6f2   :  { %v653_v30 = vpop.permute.xlu1 %652 }
 0x6f3   :  { %4112 = vmatmul.mubr.msk.f32.vlgmr.msra.gmra.mrb[8].mxu1 %vm298_vm1, %v653_v30 }
 0x6f4   :  { %4569 = vmatpush3.bf16.msra.mxu1 %v5012_v35  ;;  %4133 = vmatprep.mubr.msk.f32.mxu1 %vm4944_vm0, %v4945_v25 }
 0x6f5   :  { %4570 = vmatprep.subr.bf16.mxu1 %v4943_v21 }
 0x6f8   :  { %4572 = vmatpush3.bf16.msra.mxu1 %v5033_v52 }
 0x6f9   :  { %4579 = vmatprep.subr.bf16.mxu1 %v4943_v21 }
 0x703   :  { %v97_v34 = vpop.permute.xlu1 %96 }
 0x704   :  { %vm115_vm9 = vcmp.eq.s32.totalorder %v5021_v46, %v97_v34 }
 0x705   :  { %vm123_vm10 = vmor %vm66_vm8, %vm115_vm9  ;;  %vm71_vm9 = vcmp.eq.s32.totalorder %v5021_v46, %v63_v44 }
 0x706   :  { %4050 = vmatprep.mubr.msk.f32.mxu0 %vm123_vm10, %v4946_v49 }
 0x707   :  { %v100_v38 = vpop.permute.xlu1 %99 }
 0x708   :  { %vm116_vm12 = vcmp.eq.s32.totalorder %v5021_v46, %v100_v38 }
 0x709   :  { %vm124_vm13 = vmor %vm67_vm11, %vm116_vm12 }
 0x70a   :  { %4051 = vmatmul.mubr.msk.f32.gmra.mrb[2].mxu0 %vm124_vm13, %v4946_v49 }
 0x70b   :  { %v103_v40 = vpop.permute.xlu1 %102 }
 0x70c   :  { %vm117_vm15 = vcmp.eq.s32.totalorder %v5021_v46, %v103_v40 }
 0x70d   :  { %vm125_vm2 = vmor %vm68_vm14, %vm117_vm15 }
 0x70e   :  { %4053 = vmatprep.mubr.msk.f32.mxu0 %vm125_vm2, %v4946_v49 }
 0x70f   :  { %v106_v42 = vpop.permute.xlu1 %105 }
 0x710   :  { %vm118_vm4 = vcmp.eq.s32.totalorder %v5021_v46, %v106_v42 }
 0x711   :  { %vm126_vm5 = vmor %vm69_vm3, %vm118_vm4 }
 0x712   :  { %4054 = vmatmul.mubr.msk.f32.gmra.mrb[4].mxu0 %vm126_vm5, %v4946_v49 }
 0x713   :  { %v109_v43 = vpop.permute.xlu1 %108 }
 0x714   :  { %vm119_vm7 = vcmp.eq.s32.totalorder %v5021_v46, %v109_v43 }
 0x715   :  { %vm127_vm8 = vmor %vm70_vm6, %vm119_vm7 }
 0x716   :  { %4056 = vmatprep.mubr.msk.f32.mxu0 %vm127_vm8, %v4946_v49 }
 0x717   :  { %v112_v45 = vpop.permute.xlu1 %111 }
 0x718   :  { %vm120_vm10 = vcmp.eq.s32.totalorder %v5021_v46, %v112_v45  ;;  %v5184_v46 = vld [vmem:[#allocation2 + $0x130] sm:$0xff] }
 0x719   :  { %vm128_vm11 = vmor %vm71_vm9, %vm120_vm10 }
 0x71a   :  { %4057 = vmatmul.mubr.msk.f32.gmra.mrb[6].mxu0 %vm128_vm11, %v4946_v49 }
 0x71b   :  { %4122 = vmatprep.mubr.msk.f32.mxu0 %vm4944_vm0, %v4945_v25 }
 0x71e   :  { %4123 = vmatmul.mubr.msk.f32.vlgmr.msra.gmra.mrb[8].mxu0 %vm298_vm1, %v5082_v36 }
 0x71f   :  { %4575 = vmatpush3.bf16.msra.mxu0 %v5054_v15  ;;  %4144 = vmatprep.mubr.msk.f32.mxu0 %vm4944_vm0, %v4945_v25 }
 0x720   :  { %4576 = vmatprep.subr.bf16.mxu0 %v4943_v21 }
 0x723   :  { %4578 = vmatpush3.bf16.msra.mxu0 %v5057_v17 }
 0x724   :  { %4585 = vmatprep.subr.bf16.mxu0 %v4943_v21 }
 0x726   :  { %4145 = vmatmul.mubr.msk.f32.vlgmr.msra.gmra.mrb[10].mxu0 %vm298_vm1, %v653_v30 }
 0x727   :  { %4587 = vmatpush3.bf16.msra.mxu0 %v5115_v4  ;;  %4166 = vmatprep.mubr.msk.f32.mxu0 %vm4944_vm0, %v4945_v25 }
 0x728   :  { %4588 = vmatprep.subr.bf16.mxu0 %v4943_v21 }
 0x72b   :  { %4590 = vmatpush3.bf16.msra.mxu0 %v5118_v6 }
 0x72c   :  { %4597 = vmatprep.subr.bf16.mxu0 %v4943_v21 }
 0x7c6   :  { %v722_v49 = vpop.f32.mrb[8].mxu1 }
 0x7c7   :  { %v5187_v36 = vadd.f32 %v722_v49, %v5184_v46  ;;  %v4113_v47 = vpop.f32.mrb[9].mxu1 }
 0x7c9   :  { %v732_v48 = vadd.f32 %v5041_v57, %v5187_v36 }
 0x7cb   :  { %4134 = vmatmul.mubr.msk.f32.vlgmr.msra.gmra.mrb[10].mxu1 %vm298_vm1, %v732_v48 }
 0x7cc   :  { %4581 = vmatpush3.bf16.msra.mxu1 %v5064_v23  ;;  %4155 = vmatprep.mubr.msk.f32.mxu1 %vm4944_vm0, %v4945_v25 }
 0x7cd   :  { %4582 = vmatprep.subr.bf16.mxu1 %v4943_v21 }
 0x7d0   :  { %4584 = vmatpush3.bf16.msra.mxu1 %v5070_v29 }
 0x7d1   :  { %4591 = vmatprep.subr.bf16.mxu1 %v4943_v21 }
 0x7dd   :  { %v5198_v50 = vpop.f32.mrb[2].mxu0 }
 0x7de   :  { %v5200_v51 = vpop.f32.mrb[3].mxu0 }
 0x7e5   :  { %v5202_v53 = vpop.f32.mrb[4].mxu0 }
 0x7e6   :  { %v5204_v57 = vpop.f32.mrb[5].mxu0 }
 0x7ed   :  { %v5206_v54 = vpop.f32.mrb[6].mxu0 }
 0x7ee   :  { %v5208_v56 = vpop.f32.mrb[7].mxu0 }
 0x7f1   :  { %v799_v58 = vpop.f32.mrb[8].mxu0 }
 0x7f2   :  { %v4124_v59 = vpop.f32.mrb[9].mxu0 }
 0x7f9   :  { %v967_v61 = vpop.f32.mrb[10].mxu0 }
 0x7fa   :  { %v4146_v62 = vpop.f32.mrb[11].mxu0 }
 0x89e   :  { %v872_v63 = vpop.f32.mrb[10].mxu1 }
 0x89f   :  { %v873_v0 = vadd.f32 %v872_v63, %v799_v58  ;;  %v4135_v1 = vpop.f32.mrb[11].mxu1 }
 0x8a1   :  { %v876_v2 = vadd.f32 %v873_v0, %v5046_v60 }
 0x8a3   :  { %4800 = vtanh.f32 %v876_v2  ;;  %v3734_v5 = vmul.f32 -1.442695, %v876_v2 }
 0x8a5   :  { %4802 = vpow2.f32 %v3734_v5 }
 0x8ad   :  { %v4801_v3 = vpop.eup %4800 }
 0x8ae   :  { %886 = vrot.lane.b32.xlu0 %v4801_v3, %s4948_s15 }
 0x8af   :  { %v4803_v7 = vpop.eup %4802 }
 0x8b0   :  { %v880_v8 = vadd.f32 1.0, %v4803_v7 }
 0x8b2   :  { %4804 = vrcp.f32 %v880_v8 }
 0x8bc   :  { %v4805_v9 = vpop.eup %4804 }
 0x8bd   :  { %v884_v13 = vmul.f32 %v4805_v9, %v5051_v11 }
 0x920   :  { %v887_v10 = vpop.permute.xlu0 %886 }
 0x921   :  { %v889_v12 = vmul.f32 %v4805_v9, %v887_v10 }
 0x923   :  { %891 = vrot.lane.b32.xlu1 %v889_v12, %s4947_s14 }
 0x995   :  { %v892_v14 = vpop.permute.xlu1 %891 }
 0x996   :  { %v5214_v16 = vadd.f32 %v892_v14, %v884_v13 }
 0x998   :  { %4806 = vtanh.f32 %v5214_v16 }
 0x9a2   :  { %v4807_v18 = vpop.eup %4806 }
 0x9a3   :  { %897 = vrot.lane.b32.xlu0 %v4807_v18, %s4948_s15 }
 0xa15   :  { %v898_v19 = vpop.permute.xlu0 %897 }
 0xa16   :  { %v900_v20 = vmul.f32 %v4805_v9, %v898_v19 }
 0xa18   :  { %972 = vrot.lane.b32.xlu1 %v900_v20, %s4947_s14 }
 0xa8a   :  { %v973_v24 = vpop.permute.xlu1 %972 }
 0xa8b   :  { %4156 = vmatmul.mubr.msk.f32.vlgmr.msra.gmra.mrb[12].mxu1 %vm298_vm1, %v973_v24 }
 0xa8c   :  { %4593 = vmatpush3.bf16.msra.mxu1 %v5000_v22  ;;  %4177 = vmatprep.mubr.msk.f32.mxu1 %vm4944_vm0, %v4945_v25 }
 0xa8d   :  { %4594 = vmatprep.subr.bf16.mxu1 %v4943_v21 }
 0xa90   :  { %4596 = vmatpush3.bf16.msra.mxu1 %v5005_v28 }
 0xa91   :  { %4603 = vmatprep.subr.bf16.mxu1 %v4943_v21 }
 0xa93   :  { %4178 = vmatmul.mubr.msk.f32.vlgmr.msra.gmra.mrb[14].mxu1 %vm298_vm1, %v973_v24 }
 0xa94   :  { %4605 = vmatpush3.bf16.msra.mxu1 %v5054_v15  ;;  %4199 = vmatprep.mubr.msk.f32.mxu1 %vm4944_vm0, %v4945_v25 }
 0xa95   :  { %4606 = vmatprep.subr.bf16.mxu1 %v4943_v21 }
 0xa98   :  { %4608 = vmatpush3.bf16.msra.mxu1 %v5057_v17 }
 0xa99   :  { %4615 = vmatprep.subr.bf16.mxu1 %v4943_v21 }
 0xb5e   :  { %v1042_v11 = vpop.f32.mrb[12].mxu1 }
 0xb5f   :  { %v1043_v26 = vadd.f32 %v1042_v11, %v967_v61  ;;  %v4157_v27 = vpop.f32.mrb[13].mxu1 }
 0xb61   :  { %v1046_v30 = vadd.f32 %v1043_v26, %v5088_v37 }
 0xb63   :  { %4808 = vtanh.f32 %v1046_v30  ;;  %v3737_v34 = vmul.f32 -1.442695, %v1046_v30 }
 0xb65   :  { %4810 = vpow2.f32 %v3737_v34 }
 0xb66   :  { %v1219_v31 = vpop.f32.mrb[14].mxu1 }
 0xb67   :  { %v4179_v32 = vpop.f32.mrb[15].mxu1 }
 0xb6d   :  { %v4809_v33 = vpop.eup %4808 }
 0xb6e   :  { %1056 = vrot.lane.b32.xlu0 %v4809_v33, %s4948_s15 }
 0xb6f   :  { %v4811_v38 = vpop.eup %4810 }
 0xb70   :  { %v1050_v39 = vadd.f32 1.0, %v4811_v38 }
 0xb72   :  { %4812 = vrcp.f32 %v1050_v39 }
 0xb7c   :  { %v4813_v40 = vpop.eup %4812 }
 0xb7d   :  { %v1054_v43 = vmul.f32 %v4813_v40, %v5093_v55 }
 0xbe0   :  { %v1057_v41 = vpop.permute.xlu0 %1056 }
 0xbe1   :  { %v1059_v42 = vmul.f32 %v4813_v40, %v1057_v41 }
 0xbe3   :  { %1061 = vrot.lane.b32.xlu1 %v1059_v42, %s4947_s14 }
 0xc55   :  { %v1062_v44 = vpop.permute.xlu1 %1061 }
 0xc56   :  { %v5237_v45 = vadd.f32 %v1062_v44, %v1054_v43 }
 0xc58   :  { %4814 = vtanh.f32 %v5237_v45 }
 0xc62   :  { %v4815_v49 = vpop.eup %4814 }
 0xc63   :  { %1067 = vrot.lane.b32.xlu0 %v4815_v49, %s4948_s15 }
 0xcd5   :  { %v1068_v47 = vpop.permute.xlu0 %1067 }
 0xcd6   :  { %v1070_v48 = vmul.f32 %v4813_v40, %v1068_v47 }
 0xcd8   :  { %1072 = vrot.lane.b32.xlu1 %v1070_v48, %s4947_s14 }
 0xd4a   :  { %v1073_v58 = vpop.permute.xlu1 %1072 }
 0xd4b   :  { %4167 = vmatmul.mubr.msk.f32.vlgmr.msra.gmra.mrb[12].mxu0 %vm298_vm1, %v1073_v58  ;;  %4200 = vmatmul.mubr.msk.f32.vlgmr.msra.gmra.mrb[16].mxu1 %vm298_vm1, %v1073_v58 }
 0xd4c   :  { %4599 = vmatpush3.bf16.msra.mxu0 %v5012_v35  ;;  %4188 = vmatprep.mubr.msk.f32.mxu0 %vm4944_vm0, %v4945_v25 }
 0xd4d   :  { %4600 = vmatprep.subr.bf16.mxu0 %v4943_v21  ;;  %4617 = vmatpush3.bf16.msra.mxu1 %v5115_v4 }
 0xd4e   :  { %4618 = vmatprep.subr.bf16.mxu1 %v4943_v21  ;;  %4221 = vmatprep.mubr.msk.f32.mxu1 %vm4944_vm0, %v4945_v25 }
 0xd50   :  { %4602 = vmatpush3.bf16.msra.mxu0 %v5033_v52 }
 0xd51   :  { %4609 = vmatprep.subr.bf16.mxu0 %v4943_v21  ;;  %4620 = vmatpush3.bf16.msra.mxu1 %v5118_v6 }
 0xd52   :  { %4627 = vmatprep.subr.bf16.mxu1 %v4943_v21 }
 0xe1e   :  { %v1142_v55 = vpop.f32.mrb[12].mxu0  ;;  %v1387_v59 = vpop.f32.mrb[16].mxu1 }
 0xe1f   :  { %v5257_v61 = vadd.f32 %v1142_v55, %v5184_v46  ;;  %v4168_v62 = vpop.f32.mrb[13].mxu0  ;;  %v4201_v63 = vpop.f32.mrb[17].mxu1 }
 0xe21   :  { %v1152_v0 = vadd.f32 %v5257_v61, %v5200_v51 }
 0xe23   :  { %4189 = vmatmul.mubr.msk.f32.vlgmr.msra.gmra.mrb[14].mxu0 %vm298_vm1, %v1152_v0 }
 0xe24   :  { %4611 = vmatpush3.bf16.msra.mxu0 %v5064_v23  ;;  %4210 = vmatprep.mubr.msk.f32.mxu0 %vm4944_vm0, %v4945_v25 }
 0xe25   :  { %4612 = vmatprep.subr.bf16.mxu0 %v4943_v21 }
 0xe28   :  { %4614 = vmatpush3.bf16.msra.mxu0 %v5070_v29 }
 0xe29   :  { %4621 = vmatprep.subr.bf16.mxu0 %v4943_v21 }
 0xef6   :  { %v1292_v1 = vpop.f32.mrb[14].mxu0 }
 0xef7   :  { %v1293_v2 = vadd.f32 %v1292_v1, %v1219_v31  ;;  %v4190_v3 = vpop.f32.mrb[15].mxu0 }
 0xef9   :  { %v1296_v5 = vadd.f32 %v1293_v2, %v5046_v60 }
 0xefb   :  { %4816 = vtanh.f32 %v1296_v5  ;;  %v3742_v7 = vmul.f32 -1.442695, %v1296_v5 }
 0xefd   :  { %4818 = vpow2.f32 %v3742_v7 }
 0xf05   :  { %v4817_v51 = vpop.eup %4816 }
 0xf06   :  { %1306 = vrot.lane.b32.xlu0 %v4817_v51, %s4948_s15 }
 0xf07   :  { %v4819_v8 = vpop.eup %4818 }
 0xf08   :  { %v1300_v9 = vadd.f32 1.0, %v4819_v8 }
 0xf0a   :  { %4820 = vrcp.f32 %v1300_v9 }
 0xf14   :  { %v4821_v10 = vpop.eup %4820 }
 0xf15   :  { %v1304_v14 = vmul.f32 %v4821_v10, %v5214_v16 }
 0xf78   :  { %v1307_v12 = vpop.permute.xlu0 %1306 }
 0xf79   :  { %v1309_v13 = vmul.f32 %v4821_v10, %v1307_v12 }
 0xf7b   :  { %1311 = vrot.lane.b32.xlu1 %v1309_v13, %s4947_s14 }
 0xfed   :  { %v1312_v18 = vpop.permute.xlu1 %1311 }
 0xfee   :  { %v5272_v19 = vadd.f32 %v1312_v18, %v1304_v14 }
 0xff0   :  { %4822 = vtanh.f32 %v5272_v19 }
 0xffa   :  { %v4823_v20 = vpop.eup %4822 }
 0xffb   :  { %1317 = vrot.lane.b32.xlu0 %v4823_v20, %s4948_s15 }
0x106d   :  { %v1318_v24 = vpop.permute.xlu0 %1317 }
0x106e   :  { %v1320_v11 = vmul.f32 %v4821_v10, %v1318_v24 }
0x1070   :  { %1392 = vrot.lane.b32.xlu1 %v1320_v11, %s4947_s14 }
0x10e2   :  { %v1393_v26 = vpop.permute.xlu1 %1392 }
0x10e3   :  { %4211 = vmatmul.mubr.msk.f32.vlgmr.msra.gmra.mrb[16].mxu0 %vm298_vm1, %v1393_v26 }
0x10e4   :  { %4623 = vmatpush3.bf16.msra.mxu0 %v5000_v22  ;;  %4232 = vmatprep.mubr.msk.f32.mxu0 %vm4944_vm0, %v4945_v25 }
0x10e5   :  { %4624 = vmatprep.subr.bf16.mxu0 %v4943_v21 }
0x10e8   :  { %4626 = vmatpush3.bf16.msra.mxu0 %v5005_v28 }
0x10e9   :  { %4633 = vmatprep.subr.bf16.mxu0 %v4943_v21 }
0x10eb   :  { %4233 = vmatmul.mubr.msk.f32.vlgmr.msra.gmra.mrb[18].mxu0 %vm298_vm1, %v1393_v26 }
0x10ec   :  { %4635 = vmatpush3.bf16.msra.mxu0 %v5054_v15  ;;  %4254 = vmatprep.mubr.msk.f32.mxu0 %vm4944_vm0, %v4945_v25 }
0x10ed   :  { %4636 = vmatprep.subr.bf16.mxu0 %v4943_v21 }
0x10f0   :  { %4638 = vmatpush3.bf16.msra.mxu0 %v5057_v17 }
0x10f1   :  { %4645 = vmatprep.subr.bf16.mxu0 %v4943_v21 }
0x11b6   :  { %v1462_v16 = vpop.f32.mrb[16].mxu0 }
0x11b7   :  { %v1463_v27 = vadd.f32 %v1462_v16, %v1387_v59  ;;  %v4212_v30 = vpop.f32.mrb[17].mxu0 }
0x11b9   :  { %v1466_v31 = vadd.f32 %v1463_v27, %v5088_v37 }
0x11bb   :  { %4824 = vtanh.f32 %v1466_v31  ;;  %v3745_v38 = vmul.f32 -1.442695, %v1466_v31 }
0x11bd   :  { %4826 = vpow2.f32 %v3745_v38 }
0x11be   :  { %v1639_v32 = vpop.f32.mrb[18].mxu0 }
0x11bf   :  { %v4234_v33 = vpop.f32.mrb[19].mxu0 }
0x11c5   :  { %v4825_v34 = vpop.eup %4824 }
0x11c6   :  { %1476 = vrot.lane.b32.xlu0 %v4825_v34, %s4948_s15 }
0x11c7   :  { %v4827_v39 = vpop.eup %4826 }
0x11c8   :  { %v1470_v40 = vadd.f32 1.0, %v4827_v39 }
0x11ca   :  { %4828 = vrcp.f32 %v1470_v40 }
0x11d4   :  { %v4829_v41 = vpop.eup %4828 }
0x11d5   :  { %v1474_v44 = vmul.f32 %v4829_v41, %v5237_v45 }
0x1238   :  { %v1477_v42 = vpop.permute.xlu0 %1476 }
0x1239   :  { %v1479_v43 = vmul.f32 %v4829_v41, %v1477_v42 }
0x123b   :  { %1481 = vrot.lane.b32.xlu1 %v1479_v43, %s4947_s14 }
0x12ad   :  { %v1482_v49 = vpop.permute.xlu1 %1481 }
0x12ae   :  { %v5295_v47 = vadd.f32 %v1482_v49, %v1474_v44 }
0x12b0   :  { %4830 = vtanh.f32 %v5295_v47 }
0x12ba   :  { %v4831_v48 = vpop.eup %4830 }
0x12bb   :  { %1487 = vrot.lane.b32.xlu0 %v4831_v48, %s4948_s15 }
0x132d   :  { %v1488_v58 = vpop.permute.xlu0 %1487 }
0x132e   :  { %v1490_v55 = vmul.f32 %v4829_v41, %v1488_v58 }
0x1330   :  { %1492 = vrot.lane.b32.xlu1 %v1490_v55, %s4947_s14 }
0x13a2   :  { %v1493_v59 = vpop.permute.xlu1 %1492 }
0x13a3   :  { %4222 = vmatmul.mubr.msk.f32.vlgmr.msra.gmra.mrb[18].mxu1 %vm298_vm1, %v1493_v59  ;;  %4255 = vmatmul.mubr.msk.f32.vlgmr.msra.gmra.mrb[20].mxu0 %vm298_vm1, %v1493_v59 }
0x13a4   :  { %4629 = vmatpush3.bf16.msra.mxu1 %v5012_v35  ;;  %4243 = vmatprep.mubr.msk.f32.mxu1 %vm4944_vm0, %v4945_v25 }
0x13a5   :  { %4630 = vmatprep.subr.bf16.mxu1 %v4943_v21  ;;  %4647 = vmatpush3.bf16.msra.mxu0 %v5115_v4 }
0x13a6   :  { %4648 = vmatprep.subr.bf16.mxu0 %v4943_v21  ;;  %4276 = vmatprep.mubr.msk.f32.mxu0 %vm4944_vm0, %v4945_v25 }
0x13a8   :  { %4632 = vmatpush3.bf16.msra.mxu1 %v5033_v52 }
0x13a9   :  { %4639 = vmatprep.subr.bf16.mxu1 %v4943_v21  ;;  %4650 = vmatpush3.bf16.msra.mxu0 %v5118_v6 }
0x13aa   :  { %4657 = vmatprep.subr.bf16.mxu0 %v4943_v21 }
0x1476   :  { %v1562_v45 = vpop.f32.mrb[18].mxu1  ;;  %v1807_v62 = vpop.f32.mrb[20].mxu0 }
0x1477   :  { %v5315_v63 = vadd.f32 %v1562_v45, %v5184_v46  ;;  %v4223_v0 = vpop.f32.mrb[19].mxu1  ;;  %v4256_v1 = vpop.f32.mrb[21].mxu0 }
0x1479   :  { %v1572_v2 = vadd.f32 %v5198_v50, %v5315_v63 }
0x147b   :  { %4244 = vmatmul.mubr.msk.f32.vlgmr.msra.gmra.mrb[20].mxu1 %vm298_vm1, %v1572_v2 }
0x147c   :  { %4641 = vmatpush3.bf16.msra.mxu1 %v5064_v23  ;;  %4265 = vmatprep.mubr.msk.f32.mxu1 %vm4944_vm0, %v4945_v25 }
0x147d   :  { %4642 = vmatprep.subr.bf16.mxu1 %v4943_v21 }
0x1480   :  { %4644 = vmatpush3.bf16.msra.mxu1 %v5070_v29 }
0x1481   :  { %4651 = vmatprep.subr.bf16.mxu1 %v4943_v21 }
0x154e   :  { %v1712_v3 = vpop.f32.mrb[20].mxu1 }
0x154f   :  { %v1713_v5 = vadd.f32 %v1712_v3, %v1639_v32  ;;  %v4245_v51 = vpop.f32.mrb[21].mxu1 }
0x1551   :  { %v1716_v7 = vadd.f32 %v1713_v5, %v5046_v60 }
0x1553   :  { %4832 = vtanh.f32 %v1716_v7  ;;  %v3750_v8 = vmul.f32 -1.442695, %v1716_v7 }
0x1555   :  { %4834 = vpow2.f32 %v3750_v8 }
0x155d   :  { %v4833_v50 = vpop.eup %4832 }
0x155e   :  { %1726 = vrot.lane.b32.xlu0 %v4833_v50, %s4948_s15 }
0x155f   :  { %v4835_v9 = vpop.eup %4834 }
0x1560   :  { %v1720_v10 = vadd.f32 1.0, %v4835_v9 }
0x1562   :  { %4836 = vrcp.f32 %v1720_v10 }
0x156c   :  { %v4837_v12 = vpop.eup %4836 }
0x156d   :  { %v1724_v18 = vmul.f32 %v4837_v12, %v5272_v19 }
0x15d0   :  { %v1727_v13 = vpop.permute.xlu0 %1726 }
0x15d1   :  { %v1729_v14 = vmul.f32 %v4837_v12, %v1727_v13 }
0x15d3   :  { %1731 = vrot.lane.b32.xlu1 %v1729_v14, %s4947_s14 }
0x1645   :  { %v1732_v20 = vpop.permute.xlu1 %1731 }
0x1646   :  { %v5330_v24 = vadd.f32 %v1732_v20, %v1724_v18 }
0x1648   :  { %4838 = vtanh.f32 %v5330_v24 }
0x1652   :  { %v4839_v11 = vpop.eup %4838 }
0x1653   :  { %1737 = vrot.lane.b32.xlu0 %v4839_v11, %s4948_s15 }
0x16c5   :  { %v1738_v26 = vpop.permute.xlu0 %1737 }
0x16c6   :  { %v1740_v16 = vmul.f32 %v4837_v12, %v1738_v26 }
0x16c8   :  { %1812 = vrot.lane.b32.xlu1 %v1740_v16, %s4947_s14 }
0x173a   :  { %v1813_v27 = vpop.permute.xlu1 %1812 }
0x173b   :  { %4266 = vmatmul.mubr.msk.f32.vlgmr.msra.gmra.mrb[22].mxu1 %vm298_vm1, %v1813_v27 }
0x173c   :  { %4653 = vmatpush3.bf16.msra.mxu1 %v5000_v22  ;;  %4287 = vmatprep.mubr.msk.f32.mxu1 %vm4944_vm0, %v4945_v25 }
0x173d   :  { %4654 = vmatprep.subr.bf16.mxu1 %v4943_v21 }
0x1740   :  { %4656 = vmatpush3.bf16.msra.mxu1 %v5005_v28 }
0x1741   :  { %4663 = vmatprep.subr.bf16.mxu1 %v4943_v21 }
0x1743   :  { %4288 = vmatmul.mubr.msk.f32.vlgmr.msra.gmra.mrb[24].mxu1 %vm298_vm1, %v1813_v27 }
0x1744   :  { %4665 = vmatpush3.bf16.msra.mxu1 %v5054_v15  ;;  %4309 = vmatprep.mubr.msk.f32.mxu1 %vm4944_vm0, %v4945_v25 }
0x1745   :  { %4666 = vmatprep.subr.bf16.mxu1 %v4943_v21 }
0x1748   :  { %4668 = vmatpush3.bf16.msra.mxu1 %v5057_v17 }
0x1749   :  { %4675 = vmatprep.subr.bf16.mxu1 %v4943_v21 }
0x180e   :  { %v1882_v19 = vpop.f32.mrb[22].mxu1 }
0x180f   :  { %v1883_v30 = vadd.f32 %v1882_v19, %v1807_v62  ;;  %v4267_v31 = vpop.f32.mrb[23].mxu1 }
0x1811   :  { %v1886_v32 = vadd.f32 %v1883_v30, %v5088_v37 }
0x1813   :  { %4840 = vtanh.f32 %v1886_v32  ;;  %v3753_v39 = vmul.f32 -1.442695, %v1886_v32 }
0x1815   :  { %4842 = vpow2.f32 %v3753_v39 }
0x1816   :  { %v2059_v33 = vpop.f32.mrb[24].mxu1 }
0x1817   :  { %v4289_v34 = vpop.f32.mrb[25].mxu1 }
0x181d   :  { %v4841_v38 = vpop.eup %4840 }
0x181e   :  { %1896 = vrot.lane.b32.xlu0 %v4841_v38, %s4948_s15 }
0x181f   :  { %v4843_v40 = vpop.eup %4842 }
0x1820   :  { %v1890_v41 = vadd.f32 1.0, %v4843_v40 }
0x1822   :  { %4844 = vrcp.f32 %v1890_v41 }
0x182c   :  { %v4845_v42 = vpop.eup %4844 }
0x182d   :  { %v1894_v49 = vmul.f32 %v4845_v42, %v5295_v47 }
0x1890   :  { %v1897_v43 = vpop.permute.xlu0 %1896 }
0x1891   :  { %v1899_v44 = vmul.f32 %v4845_v42, %v1897_v43 }
0x1893   :  { %1901 = vrot.lane.b32.xlu1 %v1899_v44, %s4947_s14 }
0x1905   :  { %v1902_v48 = vpop.permute.xlu1 %1901 }
0x1906   :  { %v5353_v58 = vadd.f32 %v1902_v48, %v1894_v49 }
0x1908   :  { %4846 = vtanh.f32 %v5353_v58 }
0x1912   :  { %v4847_v55 = vpop.eup %4846 }
0x1913   :  { %1907 = vrot.lane.b32.xlu0 %v4847_v55, %s4948_s15 }
0x1985   :  { %v1908_v59 = vpop.permute.xlu0 %1907 }
0x1986   :  { %v1910_v45 = vmul.f32 %v4845_v42, %v1908_v59 }
0x1988   :  { %1912 = vrot.lane.b32.xlu1 %v1910_v45, %s4947_s14 }
0x19fa   :  { %v1913_v62 = vpop.permute.xlu1 %1912 }
0x19fb   :  { %4277 = vmatmul.mubr.msk.f32.vlgmr.msra.gmra.mrb[22].mxu0 %vm298_vm1, %v1913_v62  ;;  %4310 = vmatmul.mubr.msk.f32.vlgmr.msra.gmra.mrb[26].mxu1 %vm298_vm1, %v1913_v62 }
0x19fc   :  { %4659 = vmatpush3.bf16.msra.mxu0 %v5012_v35  ;;  %4298 = vmatprep.mubr.msk.f32.mxu0 %vm4944_vm0, %v4945_v25 }
0x19fd   :  { %4660 = vmatprep.subr.bf16.mxu0 %v4943_v21  ;;  %4677 = vmatpush3.bf16.msra.mxu1 %v5115_v4 }
0x19fe   :  { %4678 = vmatprep.subr.bf16.mxu1 %v4943_v21  ;;  %4331 = vmatprep.mubr.msk.f32.mxu1 %vm4944_vm0, %v4945_v25 }
0x1a00   :  { %4662 = vmatpush3.bf16.msra.mxu0 %v5033_v52 }
0x1a01   :  { %4669 = vmatprep.subr.bf16.mxu0 %v4943_v21  ;;  %4680 = vmatpush3.bf16.msra.mxu1 %v5118_v6 }
0x1a02   :  { %4687 = vmatprep.subr.bf16.mxu1 %v4943_v21 }
0x1ace   :  { %v1982_v47 = vpop.f32.mrb[22].mxu0  ;;  %v2227_v0 = vpop.f32.mrb[26].mxu1 }
0x1acf   :  { %v5373_v1 = vadd.f32 %v1982_v47, %v5184_v46  ;;  %v4278_v2 = vpop.f32.mrb[23].mxu0  ;;  %v4311_v3 = vpop.f32.mrb[27].mxu1 }
0x1ad1   :  { %v1992_v5 = vadd.f32 %v5373_v1, %v5204_v57 }
0x1ad3   :  { %4299 = vmatmul.mubr.msk.f32.vlgmr.msra.gmra.mrb[24].mxu0 %vm298_vm1, %v1992_v5 }
0x1ad4   :  { %4671 = vmatpush3.bf16.msra.mxu0 %v5064_v23  ;;  %4320 = vmatprep.mubr.msk.f32.mxu0 %vm4944_vm0, %v4945_v25 }
0x1ad5   :  { %4672 = vmatprep.subr.bf16.mxu0 %v4943_v21 }
0x1ad8   :  { %4674 = vmatpush3.bf16.msra.mxu0 %v5070_v29 }
0x1ad9   :  { %4681 = vmatprep.subr.bf16.mxu0 %v4943_v21 }
0x1ba6   :  { %v2132_v51 = vpop.f32.mrb[24].mxu0 }
0x1ba7   :  { %v2133_v7 = vadd.f32 %v2132_v51, %v2059_v33  ;;  %v4300_v50 = vpop.f32.mrb[25].mxu0 }
0x1ba9   :  { %v2136_v8 = vadd.f32 %v2133_v7, %v5046_v60 }
0x1bab   :  { %4848 = vtanh.f32 %v2136_v8  ;;  %v3758_v9 = vmul.f32 -1.442695, %v2136_v8  ;;  %v5442_v8 = vld [vmem:[#allocation2 + $0x100] sm:$0xff] }
0x1bad   :  { %4850 = vpow2.f32 %v3758_v9 }
0x1bb5   :  { %v4849_v57 = vpop.eup %4848 }
0x1bb6   :  { %2146 = vrot.lane.b32.xlu0 %v4849_v57, %s4948_s15 }
0x1bb7   :  { %v4851_v10 = vpop.eup %4850 }
0x1bb8   :  { %v2140_v12 = vadd.f32 1.0, %v4851_v10 }
0x1bba   :  { %4852 = vrcp.f32 %v2140_v12 }
0x1bc4   :  { %v4853_v13 = vpop.eup %4852 }
0x1bc5   :  { %v2144_v20 = vmul.f32 %v4853_v13, %v5330_v24 }
0x1c28   :  { %v2147_v14 = vpop.permute.xlu0 %2146 }
0x1c29   :  { %v2149_v18 = vmul.f32 %v4853_v13, %v2147_v14 }
0x1c2b   :  { %2151 = vrot.lane.b32.xlu1 %v2149_v18, %s4947_s14 }
0x1c9d   :  { %v2152_v11 = vpop.permute.xlu1 %2151 }
0x1c9e   :  { %v5388_v26 = vadd.f32 %v2152_v11, %v2144_v20 }
0x1ca0   :  { %4854 = vtanh.f32 %v5388_v26 }
0x1caa   :  { %v4855_v60 = vpop.eup %4854 }
0x1cab   :  { %2157 = vrot.lane.b32.xlu0 %v4855_v60, %s4948_s15 }
0x1d1d   :  { %v2158_v16 = vpop.permute.xlu0 %2157 }
0x1d1e   :  { %v2160_v27 = vmul.f32 %v4853_v13, %v2158_v16 }
0x1d20   :  { %2232 = vrot.lane.b32.xlu1 %v2160_v27, %s4947_s14 }
0x1d92   :  { %v2233_v19 = vpop.permute.xlu1 %2232 }
0x1d93   :  { %4321 = vmatmul.mubr.msk.f32.vlgmr.msra.gmra.mrb[26].mxu0 %vm298_vm1, %v2233_v19 }
0x1d94   :  { %4683 = vmatpush3.bf16.msra.mxu0 %v5000_v22  ;;  %4342 = vmatprep.mubr.msk.f32.mxu0 %vm4944_vm0, %v4945_v25 }
0x1d95   :  { %4684 = vmatprep.subr.bf16.mxu0 %v4943_v21 }
0x1d98   :  { %4686 = vmatpush3.bf16.msra.mxu0 %v5005_v28 }
0x1d99   :  { %4693 = vmatprep.subr.bf16.mxu0 %v4943_v21 }
0x1d9b   :  { %4343 = vmatmul.mubr.msk.f32.vlgmr.msra.gmra.mrb[28].mxu0 %vm298_vm1, %v2233_v19 }
0x1d9c   :  { %4695 = vmatpush3.bf16.msra.mxu0 %v5054_v15  ;;  %4364 = vmatprep.mubr.msk.f32.mxu0 %vm4944_vm0, %v4945_v25 }
0x1d9d   :  { %4696 = vmatprep.subr.bf16.mxu0 %v4943_v21 }
0x1da0   :  { %4698 = vmatpush3.bf16.msra.mxu0 %v5057_v17 }
0x1da1   :  { %4705 = vmatprep.subr.bf16.mxu0 %v4943_v21 }
0x1e66   :  { %v2302_v24 = vpop.f32.mrb[26].mxu0 }
0x1e67   :  { %v2303_v30 = vadd.f32 %v2302_v24, %v2227_v0  ;;  %v4322_v31 = vpop.f32.mrb[27].mxu0 }
0x1e69   :  { %v2306_v32 = vadd.f32 %v2303_v30, %v5088_v37 }
0x1e6b   :  { %4856 = vtanh.f32 %v2306_v32  ;;  %v3761_v39 = vmul.f32 -1.442695, %v2306_v32  ;;  %v5467_v32 = vld [vmem:[#allocation2 + $0x108] sm:$0xff] }
0x1e6d   :  { %4858 = vpow2.f32 %v3761_v39 }
0x1e6e   :  { %v2479_v33 = vpop.f32.mrb[28].mxu0 }
0x1e6f   :  { %v4344_v34 = vpop.f32.mrb[29].mxu0 }
0x1e75   :  { %v4857_v38 = vpop.eup %4856 }
0x1e76   :  { %2316 = vrot.lane.b32.xlu0 %v4857_v38, %s4948_s15 }
0x1e77   :  { %v4859_v40 = vpop.eup %4858 }
0x1e78   :  { %v2310_v41 = vadd.f32 1.0, %v4859_v40 }
0x1e7a   :  { %4860 = vrcp.f32 %v2310_v41 }
0x1e84   :  { %v4861_v42 = vpop.eup %4860 }
0x1e85   :  { %v2314_v49 = vmul.f32 %v4861_v42, %v5353_v58 }
0x1ee8   :  { %v2317_v43 = vpop.permute.xlu0 %2316 }
0x1ee9   :  { %v2319_v44 = vmul.f32 %v4861_v42, %v2317_v43 }
0x1eeb   :  { %2321 = vrot.lane.b32.xlu1 %v2319_v44, %s4947_s14 }
0x1f5d   :  { %v2322_v48 = vpop.permute.xlu1 %2321 }
0x1f5e   :  { %v5411_v37 = vadd.f32 %v2322_v48, %v2314_v49 }
0x1f60   :  { %4862 = vtanh.f32 %v5411_v37 }
0x1f6a   :  { %v4863_v55 = vpop.eup %4862 }
0x1f6b   :  { %2327 = vrot.lane.b32.xlu0 %v4863_v55, %s4948_s15 }
0x1fdd   :  { %v2328_v59 = vpop.permute.xlu0 %2327 }
0x1fde   :  { %v2330_v45 = vmul.f32 %v4861_v42, %v2328_v59 }
0x1fe0   :  { %2332 = vrot.lane.b32.xlu1 %v2330_v45, %s4947_s14 }
0x2052   :  { %v2333_v62 = vpop.permute.xlu1 %2332 }
0x2053   :  { %4332 = vmatmul.mubr.msk.f32.vlgmr.msra.gmra.mrb[28].mxu1 %vm298_vm1, %v2333_v62  ;;  %4365 = vmatmul.mubr.msk.f32.vlgmr.msra.gmra.mrb[30].mxu0 %vm298_vm1, %v2333_v62 }
0x2054   :  { %4689 = vmatpush3.bf16.msra.mxu1 %v5012_v35  ;;  %4353 = vmatprep.mubr.msk.f32.mxu1 %vm4944_vm0, %v4945_v25 }
0x2055   :  { %4690 = vmatprep.subr.bf16.mxu1 %v4943_v21  ;;  %4707 = vmatpush3.bf16.msra.mxu0 %v5115_v4 }
0x2056   :  { %4708 = vmatprep.subr.bf16.mxu0 %v4943_v21  ;;  %4386 = vmatprep.mubr.msk.f32.mxu0 %vm4944_vm0, %v4945_v25 }
0x2058   :  { %4692 = vmatpush3.bf16.msra.mxu1 %v5033_v52 }
0x2059   :  { %4699 = vmatprep.subr.bf16.mxu1 %v4943_v21  ;;  %4710 = vmatpush3.bf16.msra.mxu0 %v5118_v6 }
0x205a   :  { %4717 = vmatprep.subr.bf16.mxu0 %v4943_v21 }
0x2126   :  { %v2402_v58 = vpop.f32.mrb[28].mxu1  ;;  %v2647_v47 = vpop.f32.mrb[30].mxu0 }
0x2127   :  { %v5431_v0 = vadd.f32 %v2402_v58, %v5184_v46  ;;  %v4333_v2 = vpop.f32.mrb[29].mxu1  ;;  %v4366_v3 = vpop.f32.mrb[31].mxu0 }
0x2129   :  { %v2412_v5 = vadd.f32 %v5202_v53, %v5431_v0 }
0x212b   :  { %4354 = vmatmul.mubr.msk.f32.vlgmr.msra.gmra.mrb[30].mxu1 %vm298_vm1, %v2412_v5 }
0x212c   :  { %4701 = vmatpush3.bf16.msra.mxu1 %v5064_v23  ;;  %4375 = vmatprep.mubr.msk.f32.mxu1 %vm4944_vm0, %v4945_v25 }
0x212d   :  { %4702 = vmatprep.subr.bf16.mxu1 %v4943_v21 }
0x2130   :  { %4704 = vmatpush3.bf16.msra.mxu1 %v5070_v29 }
0x2131   :  { %4711 = vmatprep.subr.bf16.mxu1 %v4943_v21 }
0x21fe   :  { %v2552_v51 = vpop.f32.mrb[30].mxu1 }
0x21ff   :  { %v2553_v7 = vadd.f32 %v2552_v51, %v2479_v33  ;;  %v4355_v50 = vpop.f32.mrb[31].mxu1 }
0x2201   :  { %v2556_v53 = vadd.f32 %v5442_v8, %v2553_v7 }
0x2203   :  { %4864 = vtanh.f32 %v2556_v53  ;;  %v3766_v9 = vmul.f32 -1.442695, %v2556_v53 }
0x2205   :  { %4866 = vpow2.f32 %v3766_v9 }
0x220d   :  { %v4865_v57 = vpop.eup %4864 }
0x220e   :  { %2566 = vrot.lane.b32.xlu0 %v4865_v57, %s4948_s15 }
0x220f   :  { %v4867_v10 = vpop.eup %4866 }
0x2210   :  { %v2560_v12 = vadd.f32 1.0, %v4867_v10 }
0x2212   :  { %4868 = vrcp.f32 %v2560_v12 }
0x221c   :  { %v4869_v13 = vpop.eup %4868 }
0x221d   :  { %v2564_v20 = vmul.f32 %v4869_v13, %v5388_v26 }
0x2280   :  { %v2567_v14 = vpop.permute.xlu0 %2566 }
0x2281   :  { %v2569_v18 = vmul.f32 %v4869_v13, %v2567_v14 }
0x2283   :  { %2571 = vrot.lane.b32.xlu1 %v2569_v18, %s4947_s14 }
0x22f5   :  { %v2572_v11 = vpop.permute.xlu1 %2571 }
0x22f6   :  { %v5448_v60 = vadd.f32 %v2572_v11, %v2564_v20 }
0x22f8   :  { %4870 = vtanh.f32 %v5448_v60 }
0x2302   :  { %v4871_v16 = vpop.eup %4870 }
0x2303   :  { %2577 = vrot.lane.b32.xlu0 %v4871_v16, %s4948_s15 }
0x2375   :  { %v2578_v27 = vpop.permute.xlu0 %2577 }
0x2376   :  { %v2580_v19 = vmul.f32 %v4869_v13, %v2578_v27 }
0x2378   :  { %2652 = vrot.lane.b32.xlu1 %v2580_v19, %s4947_s14 }
0x23ea   :  { %v2653_v24 = vpop.permute.xlu1 %2652 }
0x23eb   :  { %4376 = vmatmul.mubr.msk.f32.vlgmr.msra.gmra.mrb[32].mxu1 %vm298_vm1, %v2653_v24 }
0x23ec   :  { %4713 = vmatpush3.bf16.msra.mxu1 %v5000_v22  ;;  %4397 = vmatprep.mubr.msk.f32.mxu1 %vm4944_vm0, %v4945_v25 }
0x23ed   :  { %4714 = vmatprep.subr.bf16.mxu1 %v4943_v21 }
0x23f0   :  { %4716 = vmatpush3.bf16.msra.mxu1 %v5005_v28 }
0x23f1   :  { %4723 = vmatprep.subr.bf16.mxu1 %v4943_v21 }
0x23f3   :  { %4398 = vmatmul.mubr.msk.f32.vlgmr.msra.gmra.mrb[34].mxu1 %vm298_vm1, %v2653_v24 }
0x23f4   :  { %4725 = vmatpush3.bf16.msra.mxu1 %v5054_v15  ;;  %4419 = vmatprep.mubr.msk.f32.mxu1 %vm4944_vm0, %v4945_v25 }
0x23f5   :  { %4726 = vmatprep.subr.bf16.mxu1 %v4943_v21 }
0x23f8   :  { %4728 = vmatpush3.bf16.msra.mxu1 %v5057_v17 }
0x23f9   :  { %4735 = vmatprep.subr.bf16.mxu1 %v4943_v21 }
0x24be   :  { %v2722_v26 = vpop.f32.mrb[32].mxu1 }
0x24bf   :  { %v2723_v30 = vadd.f32 %v2722_v26, %v2647_v47  ;;  %v4377_v31 = vpop.f32.mrb[33].mxu1 }
0x24c1   :  { %v2726_v33 = vadd.f32 %v5467_v32, %v2723_v30 }
0x24c3   :  { %4872 = vtanh.f32 %v2726_v33  ;;  %v3769_v40 = vmul.f32 -1.442695, %v2726_v33 }
0x24c5   :  { %4874 = vpow2.f32 %v3769_v40 }
0x24c6   :  { %v2899_v34 = vpop.f32.mrb[34].mxu1 }
0x24c7   :  { %v4399_v38 = vpop.f32.mrb[35].mxu1 }
0x24cd   :  { %v4873_v39 = vpop.eup %4872 }
0x24ce   :  { %2736 = vrot.lane.b32.xlu0 %v4873_v39, %s4948_s15 }
0x24cf   :  { %v4875_v41 = vpop.eup %4874 }
0x24d0   :  { %v2730_v42 = vadd.f32 1.0, %v4875_v41 }
0x24d2   :  { %4876 = vrcp.f32 %v2730_v42 }
0x24dc   :  { %v4877_v43 = vpop.eup %4876 }
0x24dd   :  { %v2734_v48 = vmul.f32 %v4877_v43, %v5411_v37 }
0x2540   :  { %v2737_v44 = vpop.permute.xlu0 %2736 }
0x2541   :  { %v2739_v49 = vmul.f32 %v4877_v43, %v2737_v44 }
0x2543   :  { %2741 = vrot.lane.b32.xlu1 %v2739_v49, %s4947_s14 }
0x25b5   :  { %v2742_v55 = vpop.permute.xlu1 %2741 }
0x25b6   :  { %v5473_v59 = vadd.f32 %v2742_v55, %v2734_v48 }
0x25b8   :  { %4878 = vtanh.f32 %v5473_v59 }
0x25c2   :  { %v4879_v45 = vpop.eup %4878 }
0x25c3   :  { %2747 = vrot.lane.b32.xlu0 %v4879_v45, %s4948_s15 }
0x2635   :  { %v2748_v62 = vpop.permute.xlu0 %2747 }
0x2636   :  { %v2750_v58 = vmul.f32 %v4877_v43, %v2748_v62  ;;  %v5549_v62 = vld [vmem:[#allocation2 + $0x130] sm:$0xff] }
0x2638   :  { %2752 = vrot.lane.b32.xlu1 %v2750_v58, %s4947_s14 }
0x26aa   :  { %v2753_v47 = vpop.permute.xlu1 %2752 }
0x26ab   :  { %4387 = vmatmul.mubr.msk.f32.vlgmr.msra.gmra.mrb[32].mxu0 %vm298_vm1, %v2753_v47  ;;  %4420 = vmatmul.mubr.msk.f32.vlgmr.msra.gmra.mrb[36].mxu1 %vm298_vm1, %v2753_v47 }
0x26ac   :  { %4719 = vmatpush3.bf16.msra.mxu0 %v5012_v35  ;;  %4408 = vmatprep.mubr.msk.f32.mxu0 %vm4944_vm0, %v4945_v25 }
0x26ad   :  { %4720 = vmatprep.subr.bf16.mxu0 %v4943_v21  ;;  %4737 = vmatpush3.bf16.msra.mxu1 %v5115_v4 }
0x26ae   :  { %4738 = vmatprep.subr.bf16.mxu1 %v4943_v21  ;;  %4441 = vmatprep.mubr.msk.f32.mxu1 %vm4944_vm0, %v4945_v25 }
0x26b0   :  { %4722 = vmatpush3.bf16.msra.mxu0 %v5033_v52 }
0x26b1   :  { %4729 = vmatprep.subr.bf16.mxu0 %v4943_v21  ;;  %4740 = vmatpush3.bf16.msra.mxu1 %v5118_v6 }
0x26b2   :  { %4747 = vmatprep.subr.bf16.mxu1 %v4943_v21 }
0x277e   :  { %v2822_v37 = vpop.f32.mrb[32].mxu0  ;;  %v3067_v2 = vpop.f32.mrb[36].mxu1 }
0x277f   :  { %v5493_v3 = vadd.f32 %v2822_v37, %v5184_v46  ;;  %v4388_v5 = vpop.f32.mrb[33].mxu0  ;;  %v4421_v51 = vpop.f32.mrb[37].mxu1 }
0x2781   :  { %v2832_v7 = vadd.f32 %v5493_v3, %v5208_v56 }
0x2783   :  { %4409 = vmatmul.mubr.msk.f32.vlgmr.msra.gmra.mrb[34].mxu0 %vm298_vm1, %v2832_v7 }
0x2784   :  { %4731 = vmatpush3.bf16.msra.mxu0 %v5064_v23  ;;  %4430 = vmatprep.mubr.msk.f32.mxu0 %vm4944_vm0, %v4945_v25 }
0x2785   :  { %4732 = vmatprep.subr.bf16.mxu0 %v4943_v21 }
0x2788   :  { %4734 = vmatpush3.bf16.msra.mxu0 %v5070_v29 }
0x2789   :  { %4741 = vmatprep.subr.bf16.mxu0 %v4943_v21 }
0x2856   :  { %v2972_v46 = vpop.f32.mrb[34].mxu0 }
0x2857   :  { %v2973_v50 = vadd.f32 %v2972_v46, %v2899_v34  ;;  %v4410_v53 = vpop.f32.mrb[35].mxu0 }
0x2859   :  { %v2976_v57 = vadd.f32 %v5442_v8, %v2973_v50 }
0x285b   :  { %4880 = vtanh.f32 %v2976_v57  ;;  %v3774_v9 = vmul.f32 -1.442695, %v2976_v57 }
0x285d   :  { %4882 = vpow2.f32 %v3774_v9 }
0x2865   :  { %v4881_v56 = vpop.eup %4880 }
0x2866   :  { %2986 = vrot.lane.b32.xlu0 %v4881_v56, %s4948_s15 }
0x2867   :  { %v4883_v10 = vpop.eup %4882 }
0x2868   :  { %v2980_v12 = vadd.f32 1.0, %v4883_v10 }
0x286a   :  { %4884 = vrcp.f32 %v2980_v12 }
0x2874   :  { %v4885_v13 = vpop.eup %4884 }
0x2875   :  { %v2984_v20 = vmul.f32 %v4885_v13, %v5448_v60 }
0x28d8   :  { %v2987_v14 = vpop.permute.xlu0 %2986 }
0x28d9   :  { %v2989_v18 = vmul.f32 %v4885_v13, %v2987_v14 }
0x28db   :  { %2991 = vrot.lane.b32.xlu1 %v2989_v18, %s4947_s14 }
0x294d   :  { %v2992_v11 = vpop.permute.xlu1 %2991 }
0x294e   :  { %v5508_v16 = vadd.f32 %v2992_v11, %v2984_v20 }
0x2950   :  { %4886 = vtanh.f32 %v5508_v16 }
0x295a   :  { %v4887_v27 = vpop.eup %4886 }
0x295b   :  { %2997 = vrot.lane.b32.xlu0 %v4887_v27, %s4948_s15 }
0x29cd   :  { %v2998_v19 = vpop.permute.xlu0 %2997 }
0x29ce   :  { %v3000_v24 = vmul.f32 %v4885_v13, %v2998_v19 }
0x29d0   :  { %3072 = vrot.lane.b32.xlu1 %v3000_v24, %s4947_s14 }
0x2a42   :  { %v3073_v26 = vpop.permute.xlu1 %3072 }
0x2a43   :  { %4431 = vmatmul.mubr.msk.f32.vlgmr.msra.gmra.mrb[36].mxu0 %vm298_vm1, %v3073_v26 }
0x2a44   :  { %4743 = vmatpush3.bf16.msra.mxu0 %v5000_v22  ;;  %4452 = vmatprep.mubr.msk.f32.mxu0 %vm4944_vm0, %v4945_v25 }
0x2a45   :  { %4744 = vmatprep.subr.bf16.mxu0 %v4943_v21 }
0x2a48   :  { %4746 = vmatpush3.bf16.msra.mxu0 %v5005_v28 }
0x2a49   :  { %4753 = vmatprep.subr.bf16.mxu0 %v4943_v21 }
0x2a4b   :  { %4453 = vmatmul.mubr.msk.f32.vlgmr.msra.gmra.mrb[38].mxu0 %vm298_vm1, %v3073_v26 }
0x2a4c   :  { %4755 = vmatpush3.bf16.msra.mxu0 %v5054_v15  ;;  %4474 = vmatprep.mubr.msk.f32.mxu0 %vm4944_vm0, %v4945_v25 }
0x2a4d   :  { %4756 = vmatprep.subr.bf16.mxu0 %v4943_v21 }
0x2a50   :  { %4758 = vmatpush3.bf16.msra.mxu0 %v5057_v17 }
0x2a51   :  { %4765 = vmatprep.subr.bf16.mxu0 %v4943_v21 }
0x2b16   :  { %v3142_v22 = vpop.f32.mrb[36].mxu0 }
0x2b17   :  { %v3143_v60 = vadd.f32 %v3142_v22, %v3067_v2  ;;  %v4432_v30 = vpop.f32.mrb[37].mxu0 }
0x2b19   :  { %v3146_v28 = vadd.f32 %v5467_v32, %v3143_v60 }
0x2b1b   :  { %4888 = vtanh.f32 %v3146_v28  ;;  %v3777_v15 = vmul.f32 -1.442695, %v3146_v28 }
0x2b1d   :  { %4890 = vpow2.f32 %v3777_v15 }
0x2b1e   :  { %v3319_v31 = vpop.f32.mrb[38].mxu0 }
0x2b1f   :  { %v4454_v33 = vpop.f32.mrb[39].mxu0 }
0x2b25   :  { %v4889_v34 = vpop.eup %4888 }
0x2b26   :  { %3156 = vrot.lane.b32.xlu0 %v4889_v34, %s4948_s15 }
0x2b27   :  { %v4891_v38 = vpop.eup %4890 }
0x2b28   :  { %v3150_v39 = vadd.f32 1.0, %v4891_v38 }
0x2b2a   :  { %4892 = vrcp.f32 %v3150_v39 }
0x2b34   :  { %v4893_v40 = vpop.eup %4892 }
0x2b35   :  { %v3154_v42 = vmul.f32 %v4893_v40, %v5473_v59 }
0x2b98   :  { %v3157_v17 = vpop.permute.xlu0 %3156 }
0x2b99   :  { %v3159_v41 = vmul.f32 %v4893_v40, %v3157_v17 }
0x2b9b   :  { %3161 = vrot.lane.b32.xlu1 %v3159_v41, %s4947_s14 }
0x2c0d   :  { %v3162_v43 = vpop.permute.xlu1 %3161 }
0x2c0e   :  { %v5531_v44 = vadd.f32 %v3162_v43, %v3154_v42 }
0x2c10   :  { %4894 = vtanh.f32 %v5531_v44 }
0x2c1a   :  { %v4895_v49 = vpop.eup %4894 }
0x2c1b   :  { %3167 = vrot.lane.b32.xlu0 %v4895_v49, %s4948_s15 }
0x2c8d   :  { %v3168_v48 = vpop.permute.xlu0 %3167 }
0x2c8e   :  { %v3170_v55 = vmul.f32 %v4893_v40, %v3168_v48 }
0x2c90   :  { %3172 = vrot.lane.b32.xlu1 %v3170_v55, %s4947_s14 }
0x2d02   :  { %v3173_v45 = vpop.permute.xlu1 %3172 }
0x2d03   :  { %4442 = vmatmul.mubr.msk.f32.vlgmr.msra.gmra.mrb[38].mxu1 %vm298_vm1, %v3173_v45  ;;  %4475 = vmatmul.mubr.msk.f32.vlgmr.msra.gmra.mrb[40].mxu0 %vm298_vm1, %v3173_v45 }
0x2d04   :  { %4749 = vmatpush3.bf16.msra.mxu1 %v5012_v35  ;;  %4463 = vmatprep.mubr.msk.f32.mxu1 %vm4944_vm0, %v4945_v25 }
0x2d05   :  { %4750 = vmatprep.subr.bf16.mxu1 %v4943_v21  ;;  %4767 = vmatpush3.bf16.msra.mxu0 %v5115_v4 }
0x2d06   :  { %4768 = vmatprep.subr.bf16.mxu0 %v4943_v21  ;;  %4496 = vmatprep.mubr.msk.f32.mxu0 %vm4944_vm0, %v4945_v25 }
0x2d08   :  { %4752 = vmatpush3.bf16.msra.mxu1 %v5033_v52 }
0x2d09   :  { %4759 = vmatprep.subr.bf16.mxu1 %v4943_v21  ;;  %4770 = vmatpush3.bf16.msra.mxu0 %v5118_v6 }
0x2dd6   :  { %v3242_v59 = vpop.f32.mrb[38].mxu1  ;;  %v3487_v35 = vpop.f32.mrb[40].mxu0 }
0x2dd7   :  { %v3243_v58 = vadd.f32 %v5549_v62, %v3242_v59  ;;  %v4443_v47 = vpop.f32.mrb[39].mxu1  ;;  %v4476_v37 = vpop.f32.mrb[41].mxu0 }
0x2dd9   :  { %v3252_v4 = vadd.f32 %v5206_v54, %v3243_v58 }
0x2ddb   :  { %4464 = vmatmul.mubr.msk.f32.vlgmr.msra.gmra.mrb[40].mxu1 %vm298_vm1, %v3252_v4 }
0x2ddc   :  { %4761 = vmatpush3.bf16.msra.mxu1 %v5064_v23  ;;  %4485 = vmatprep.mubr.msk.f32.mxu1 %vm4944_vm0, %v4945_v25  ;;  %vm730_vm0 = vcmask 64512  }
0x2ddd   :  { %4762 = vmatprep.subr.bf16.mxu1 %v4943_v21 }
0x2de0   :  { %4764 = vmatpush3.bf16.msra.mxu1 %v5070_v29 }
0x2eae   :  { %v3392_v52 = vpop.f32.mrb[40].mxu1 }
0x2eaf   :  { %v3393_v6 = vadd.f32 %v3392_v52, %v3319_v31  ;;  %v4465_v2 = vpop.f32.mrb[41].mxu1 }
0x2eb1   :  { %v3396_v5 = vadd.f32 %v5442_v8, %v3393_v6 }
0x2eb3   :  { %4896 = vtanh.f32 %v3396_v5  ;;  %v3782_v54 = vmul.f32 -1.442695, %v3396_v5 }
0x2eb5   :  { %4898 = vpow2.f32 %v3782_v54 }
0x2ebd   :  { %v4897_v51 = vpop.eup %4896 }
0x2ebe   :  { %3406 = vrot.lane.b32.xlu0 %v4897_v51, %s4948_s15 }
0x2ebf   :  { %v4899_v7 = vpop.eup %4898 }
0x2ec0   :  { %v3400_v23 = vadd.f32 1.0, %v4899_v7 }
0x2ec2   :  { %4900 = vrcp.f32 %v3400_v23 }
0x2ecc   :  { %v4901_v46 = vpop.eup %4900 }
0x2ecd   :  { %v3404_v21 = vmul.f32 %v4901_v46, %v5508_v16 }
0x2f30   :  { %v3407_v25 = vpop.permute.xlu0 %3406 }
0x2f31   :  { %v3409_v50 = vmul.f32 %v4901_v46, %v3407_v25 }
0x2f33   :  { %3411 = vrot.lane.b32.xlu1 %v3409_v50, %s4947_s14 }
0x2fa5   :  { %v3412_v29 = vpop.permute.xlu1 %3411 }
0x2fa6   :  { %v3414_v53 = vadd.f32 %v3412_v29, %v3404_v21 }
0x2fa8   :  { %4902 = vtanh.f32 %v3414_v53 }
0x2fb2   :  { %v4903_v8 = vpop.eup %4902 }
0x2fb3   :  { %3417 = vrot.lane.b32.xlu0 %v4903_v8, %s4948_s15 }
0x3025   :  { %v3418_v57 = vpop.permute.xlu0 %3417 }
0x3026   :  { %v3420_v56 = vmul.f32 %v4901_v46, %v3418_v57 }
0x3028   :  { %3492 = vrot.lane.b32.xlu1 %v3420_v56, %s4947_s14 }
0x309a   :  { %v3493_v9 = vpop.permute.xlu1 %3492 }
0x309b   :  { %3673 = vst.msk [vmem:[%s5642_s4] sm:$0xff] %vm298_vm1, %v3493_v9  ;;  %4486 = vmatmul.mubr.msk.f32.vlgmr.msra.gmra.mrb[42].mxu1 %vm298_vm1, %v3493_v9 }
0x316e   :  { %v3562_v10 = vpop.f32.mrb[42].mxu1 }
0x316f   :  { %v3563_v12 = vadd.f32 %v3562_v10, %v3487_v35  ;;  %v4487_v13 = vpop.f32.mrb[43].mxu1 }
0x3171   :  { %v3566_v14 = vadd.f32 %v5467_v32, %v3563_v12 }
0x3173   :  { %4904 = vtanh.f32 %v3566_v14  ;;  %v3785_v20 = vmul.f32 -1.442695, %v3566_v14 }
0x3175   :  { %4906 = vpow2.f32 %v3785_v20 }
0x317d   :  { %v4905_v18 = vpop.eup %4904 }
0x317e   :  { %3576 = vrot.lane.b32.xlu0 %v4905_v18, %s4948_s15 }
0x317f   :  { %v4907_v11 = vpop.eup %4906 }
0x3180   :  { %v3570_v16 = vadd.f32 1.0, %v4907_v11 }
0x3182   :  { %4908 = vrcp.f32 %v3570_v16 }
0x318c   :  { %v4909_v27 = vpop.eup %4908 }
0x318d   :  { %v3574_v26 = vmul.f32 %v4909_v27, %v5531_v44 }
0x31f0   :  { %v3577_v19 = vpop.permute.xlu0 %3576 }
0x31f1   :  { %v3579_v24 = vmul.f32 %v4909_v27, %v3577_v19 }
0x31f3   :  { %3581 = vrot.lane.b32.xlu1 %v3579_v24, %s4947_s14 }
0x3265   :  { %v3582_v22 = vpop.permute.xlu1 %3581 }
0x3266   :  { %v3584_v60 = vadd.f32 %v3582_v22, %v3574_v26 }
0x3268   :  { %4910 = vtanh.f32 %v3584_v60 }
0x3272   :  { %v4911_v32 = vpop.eup %4910 }
0x3273   :  { %3587 = vrot.lane.b32.xlu0 %v4911_v32, %s4948_s15 }
0x3277   :  { %727 = vrot.lane.b32.xlu0 %v5187_v36, %s4949_s19 }
0x327b   :  { %1567 = vrot.lane.b32.xlu0 %v5315_v63, %s4949_s19 }
0x327f   :  { %2407 = vrot.lane.b32.xlu0 %v5431_v0, %s4949_s19 }
0x3283   :  { %3247 = vrot.lane.b32.xlu0 %v3243_v58, %s4949_s19 }
0x3287   :  { %3675 = vrot.lane.b32.xlu0 %v3414_v53, %s4949_s19 }
0x32e5   :  { %v3588_v30 = vpop.permute.xlu0 %3587 }
0x32e6   :  { %v3590_v28 = vmul.f32 %v4909_v27, %v3588_v30 }
0x32e8   :  { %3592 = vrot.lane.b32.xlu1 %v3590_v28, %s4947_s14 }
0x32e9   :  { %v728_v31 = vpop.permute.xlu0 %727 }
0x32ea   :  { %731 = vst.msk [vmem:[%s5641_s3] sm:$0xff] %vm730_vm0, %v728_v31 }
0x32ec   :  { %1147 = vrot.lane.b32.xlu1 %v5257_v61, %s4949_s19 }
0x32ed   :  { %v1568_v36 = vpop.permute.xlu0 %1567 }
0x32ee   :  { %3747 = vst.msk [vmem:[%s5641_s3 + $0x10] sm:$0xff] %vm730_vm0, %v1568_v36 }
0x32f0   :  { %1987 = vrot.lane.b32.xlu1 %v5373_v1, %s4949_s19 }
0x32f1   :  { %v2408_v63 = vpop.permute.xlu0 %2407 }
0x32f2   :  { %3763 = vst.msk [vmem:[%s5641_s3 + $0x20] sm:$0xff] %vm730_vm0, %v2408_v63 }
0x32f4   :  { %2827 = vrot.lane.b32.xlu1 %v5493_v3, %s4949_s19 }
0x32f5   :  { %v3248_v0 = vpop.permute.xlu0 %3247 }
0x32f6   :  { %3779 = vst.msk [vmem:[%s5641_s3 + $0x30] sm:$0xff] %vm730_vm0, %v3248_v0 }
0x32f9   :  { %v3676_v61 = vpop.permute.xlu0 %3675 }
0x32fa   :  { %3788 = vst.msk [vmem:[%s5642_s4 + $0x10] sm:$0xff] %vm298_vm1, %v3676_v61 }
0x335a   :  { %v3593_v1 = vpop.permute.xlu1 %3592 }
0x335b   :  { %3789 = vst.msk [vmem:[%s5642_s4 + $0x8] sm:$0xff] %vm298_vm1, %v3593_v1  ;;  %4497 = vmatmul.mubr.msk.f32.vlgmr.msra.gmra.mrb[42].mxu0 %vm298_vm1, %v3593_v1 }
0x335e   :  { %v1148_v3 = vpop.permute.xlu1 %1147 }
0x335f   :  { %3739 = vst.msk [vmem:[%s5641_s3 + $0x8] sm:$0xff] %vm730_vm0, %v1148_v3 }
0x3362   :  { %v1988_v33 = vpop.permute.xlu1 %1987 }
0x3363   :  { %3755 = vst.msk [vmem:[%s5641_s3 + $0x18] sm:$0xff] %vm730_vm0, %v1988_v33 }
0x3366   :  { %v2828_v34 = vpop.permute.xlu1 %2827 }
0x3367   :  { %3771 = vst.msk [vmem:[%s5641_s3 + $0x28] sm:$0xff] %vm730_vm0, %v2828_v34 }
0x342e   :  { %v3662_v15 = vpop.f32.mrb[42].mxu0 }
0x342f   :  { %v3663_v38 = vadd.f32 %v5549_v62, %v3662_v15  ;;  %v4498_v39 = vpop.f32.mrb[43].mxu0 }
0x3431   :  { %3667 = vrot.lane.b32.xlu1 %v3663_v38, %s4949_s19 }
0x3435   :  { %3684 = vrot.lane.b32.xlu1 %v3584_v60, %s4949_s19 }
0x34a3   :  { %v3668_v40 = vpop.permute.xlu1 %3667 }
0x34a4   :  { %3787 = vst.msk [vmem:[%s5641_s3 + $0x38] sm:$0xff] %vm730_vm0, %v3668_v40 }
0x34a7   :  { %v3685_v17 = vpop.permute.xlu1 %3684 }
0x34a8   :  { %3790 = vst.msk [vmem:[%s5642_s4 + $0x18] sm:$0xff] %vm298_vm1, %v3685_v17 }
0x34a9   :  { %3697 = vsyncpa [#allocation3], 1 }

</bundles_post_ra>
